<compile_context>
chip_gen: v7x
topology: tpu7x:2x2x1
jax: 0.10.0
libtpu: 0.0.40
codegen_flags: <defaults>
</compile_context>

<pallas_src>
import jax
import jax.numpy as jnp
from jax.experimental import pallas as pl
from jax.experimental.pallas import tpu as pltpu

NUM_FEATURES = 16
NUM_CLASSES = 5
HIDDEN = [64, 32, 32, 32]
BN_EPS = 1e-5
PAD = 128  # lane-dense width used for hidden/output activations


# --------------------------------- kernel --------------------------------- #

def jsc_s_kernel(x_ref, bn_in_ref, w1_ref, ws_ref, vec_ref, out_ref):
    relu = lambda t: jnp.maximum(t, 0.0)
    f32 = jnp.float32
    bf16 = jnp.bfloat16

    bn_in = bn_in_ref[...]          # (2, 16)  f32: input-BN scale / shift
    vec = vec_ref[...]              # (8, 128) f32: folded biases / BN shifts

    # --- BN(in) -> ReLU ----------------------------------------------------
    x = x_ref[...]                  # (bt, 16) f32
    x = relu(x * bn_in[0] + bn_in[1])

    # --- Linear(16,64) -> BN -> ReLU  (bn1 scale pre-folded into w1) --------
    h = relu(jnp.dot(x.astype(bf16), w1_ref[...],
                     preferred_element_type=f32) + vec[0])

    # --- Linear(64,32) -> ReLU / Linear(32,32) -> ReLU / Linear(32,32) -> ReLU
    h = relu(jnp.dot(h.astype(bf16), ws_ref[0], preferred_element_type=f32) + vec[1])
    h = relu(jnp.dot(h.astype(bf16), ws_ref[1], preferred_element_type=f32) + vec[2])
    h = relu(jnp.dot(h.astype(bf16), ws_ref[2], preferred_element_type=f32) + vec[3])

    # --- Linear(32,5) -> BN -> ReLU  (bn5 scale pre-folded into w5) ---------
    h = relu(jnp.dot(h.astype(bf16), ws_ref[3], preferred_element_type=f32) + vec[4])

    out_ref[...] = h.astype(out_ref.dtype)   # lane-dense (bt, 128) store


# -------------------------------- wrapper ---------------------------------- #

def _round_up(n, m):
    return ((n + m - 1) // m) * m


def jsc_s_forward(x, packed_params, *, batch_tile=512):
    """x: [B, NUM_FEATURES] float32  ->  [B, NUM_CLASSES] float32."""
    bn_in, w1p, wslab, vecs = packed_params
    B, F = x.shape
    assert F == NUM_FEATURES

    # Clamp the tile for tiny batches, keep it a multiple of 8, pad B up.
    bt = _round_up(min(batch_tile, _round_up(B, 8)), 8)
    Bp = _round_up(B, bt)
    if Bp != B:
        x = jnp.pad(x, ((0, Bp - B), (0, 0)))

    def resident(arr):
        nd = arr.ndim
        return pl.BlockSpec(arr.shape, lambda i, _n=nd: (0,) * _n)

    grid = (Bp // bt,)

    out = pl.pallas_call(
        jsc_s_kernel,
        out_shape=jax.ShapeDtypeStruct((Bp, PAD), jnp.float32),
        grid_spec=pltpu.PrefetchScalarGridSpec(
            num_scalar_prefetch=0,
            grid=grid,
            in_specs=[
                pl.BlockSpec((bt, NUM_FEATURES), lambda i: (i, 0)),
                resident(bn_in),    # (2, 16)       f32
                resident(w1p),      # (16, 128)     bf16
                resident(wslab),    # (4, 128, 128) bf16
                resident(vecs),     # (8, 128)      f32
            ],
            out_specs=pl.BlockSpec((bt, PAD), lambda i: (i, 0)),
        ),
        compiler_params=pltpu.CompilerParams(
            dimension_semantics=("parallel",)),
    )(x, bn_in, w1p, wslab, vecs)

    return out[:B, :NUM_CLASSES]


# ----------------------- deterministic parameter init ----------------------- #

def init_linear(key, fan_in, fan_out):
    # PyTorch nn.Linear default: U(-1/sqrt(fan_in), 1/sqrt(fan_in)); weight
    # stored pre-transposed to [in, out] so the kernel computes x @ W + b.
    kw, kb = jax.random.split(key)
    bound = 1.0 / jnp.sqrt(jnp.float32(fan_in))
    w = jax.random.uniform(kw, (fan_in, fan_out), jnp.float32, -bound, bound)
    b = jax.random.uniform(kb, (fan_out,), jnp.float32, -bound, bound)
    return w, b


def init_bn(key, num_feat):
    kg, kb, km, kv = jax.random.split(key, 4)
    gamma = jax.random.uniform(kg, (num_feat,), jnp.float32, 0.5, 1.5)
    beta = 0.1 * jax.random.normal(kb, (num_feat,), jnp.float32)
    mean = 0.1 * jax.random.normal(km, (num_feat,), jnp.float32)
    var = jax.random.uniform(kv, (num_feat,), jnp.float32, 0.5, 1.5)
    scale = gamma / jnp.sqrt(var + BN_EPS)
    shift = beta - mean * scale
    return jnp.stack([scale, shift], axis=0)  # (2, num_feat): folded eval-mode BN


def make_params(key):
    dims = [NUM_FEATURES] + HIDDEN + [NUM_CLASSES]
    keys = jax.random.split(key, 8)
    bn_in = init_bn(keys[0], dims[0])
    w1, b1 = init_linear(keys[1], dims[0], dims[1])
    bn1 = init_bn(keys[2], dims[1])
    w2, b2 = init_linear(keys[3], dims[1], dims[2])
    w3, b3 = init_linear(keys[4], dims[2], dims[3])
    w4, b4 = init_linear(keys[5], dims[3], dims[4])
    w5, b5 = init_linear(keys[6], dims[4], dims[5])
    bn5 = init_bn(keys[7], dims[5])
    return (bn_in, w1, b1, bn1, w2, b2, w3, b3, w4, b4, w5, b5, bn5)


def pack_params(params):
    """Fold the 13 module parameter arrays into 4 kernel slabs."""
    (bn_in, w1, b1, bn1, w2, b2, w3, b3, w4, b4, w5, b5, bn5) = params

    # Fold post-Linear BatchNorms into the preceding Linear:
    #   relu((x@W + b)*s + t) == relu(x@(W*s) + (b*s + t))
    w1f = w1 * bn1[0][None, :]
    c1 = b1 * bn1[0] + bn1[1]
    w5f = w5 * bn5[0][None, :]
    c5 = b5 * bn5[0] + bn5[1]

    def pad_cols(w, rows=None):
        r = w.shape[0] if rows is None else rows
        out = jnp.zeros((r, PAD), jnp.float32)
        return out.at[: w.shape[0], : w.shape[1]].set(w)

    def pad_vec(v):
        return jnp.zeros((PAD,), jnp.float32).at[: v.shape[0]].set(v)

    # Layer-1 weight (BN-folded): (16, 64) -> (16, 128), bf16 for the MXU.
    w1p = pad_cols(w1f).astype(jnp.bfloat16)
    # Layers 2..5 weights zero-padded to (128, 128) and stacked -> (4,128,128).
    wslab = jnp.stack([pad_cols(w, rows=PAD) for w in (w2, w3, w4, w5f)])
    wslab = wslab.astype(jnp.bfloat16)
    # Bias / folded-BN-shift slab, one 128-wide f32 row per layer:
    #   0: c1 (= b1*s1 + t1), 1: b2, 2: b3, 3: b4, 4: c5 (= b5*s5 + t5),
    #   5..7: zero padding.
    rows = [c1, b2, b3, b4, c5]
    vecs = jnp.zeros((8, PAD), jnp.float32)
    vecs = vecs.at[: len(rows)].set(jnp.stack([pad_vec(r) for r in rows]))
    return (bn_in, w1p, wslab, vecs)


# ------------------------------- references --------------------------------- #

def jsc_s_reference(x, params):
    """Exact f32 eval-mode module math."""
    (bn_in, w1, b1, bn1, w2, b2, w3, b3, w4, b4, w5, b5, bn5) = params
    relu = lambda t: jnp.maximum(t, 0.0)
    x = relu(x * bn_in[0] + bn_in[1])
    x = relu((x @ w1 + b1) * bn1[0] + bn1[1])
    x = relu(x @ w2 + b2)
    x = relu(x @ w3 + b3)
    x = relu(x @ w4 + b4)
    x = relu((x @ w5 + b5) * bn5[0] + bn5[1])
    return x


def jsc_s_reference_packed(x, params):
    """Mirrors the kernel's BN folding + bf16 weight rounding (f32 activations)."""
    (bn_in, w1, b1, bn1, w2, b2, w3, b3, w4, b4, w5, b5, bn5) = params
    relu = lambda t: jnp.maximum(t, 0.0)
    rnd = lambda w: w.astype(jnp.bfloat16).astype(jnp.float32)
    w1f, c1 = rnd(w1 * bn1[0][None, :]), b1 * bn1[0] + bn1[1]
    w5f, c5 = rnd(w5 * bn5[0][None, :]), b5 * bn5[0] + bn5[1]
    x = relu(x * bn_in[0] + bn_in[1])
    x = relu(x @ w1f + c1)
    x = relu(x @ rnd(w2) + b2)
    x = relu(x @ rnd(w3) + b3)
    x = relu(x @ rnd(w4) + b4)
    x = relu(x @ w5f + c5)
    return x


# ---------------------------------- main ------------------------------------ #

if __name__ == "__main__":
    key = jax.random.PRNGKey(0)
    k_params, k_x = jax.random.split(key)
    params = make_params(k_params)
    packed = pack_params(params)

    # batch_tile=256 on a batch of 1024 -> grid of 4 "parallel" steps
    # (keeps both v7x TensorCores busy; harmless on v5e/v6e).
    batch = 1024
    x = jax.random.normal(k_x, (batch, NUM_FEATURES), jnp.float32)

    out = jsc_s_forward(x, packed, batch_tile=256)
    out = jax.block_until_ready(out)
    assert out.shape == (batch, NUM_CLASSES)

    # Tight numerical check: reference with the same BN folding and bf16-rounded
    # weights (remaining difference = in-kernel activation rounding + MXU acc).
    ref_packed = jsc_s_reference_packed(x, params)
    assert jnp.allclose(out, ref_packed, atol=3e-2, rtol=3e-2), \
        "mismatch vs bf16-weight packed reference"

    # Semantic check against the exact f32 module math (looser tolerance covers
    # the bf16 matmul-input rounding).
    ref_f32 = jsc_s_reference(x, params)
    assert jnp.allclose(out, ref_f32, atol=1e-1, rtol=1e-1), \
        "mismatch vs f32 reference"

    # Small / ragged batch exercises the tile-clamp + row-padding path.
    out_small = jax.block_until_ready(jsc_s_forward(x[:10], packed))
    assert out_small.shape == (10, NUM_CLASSES)
    assert jnp.allclose(out_small, ref_packed[:10], atol=3e-2, rtol=3e-2)

    # TODO(synk): training-mode BatchNorm (per-batch statistics) is not
    # implemented; the kernel uses eval-mode running-stats BN folded to
    # per-feature scale/shift, matching module.eval() inference semantics.
    print("KERNEL_OK")
</pallas_src>

<mosaic_0001>
module attributes {stable_mosaic.version = 11 : i64} {
  func.func @jsc_s_kernel(%arg0: i32, %arg1: memref<256x16xf32, #tpu.memory_space<vmem>>, %arg2: memref<2x16xf32, #tpu.memory_space<vmem>>, %arg3: memref<16x128xbf16, #tpu.memory_space<vmem>>, %arg4: memref<4x128x128xbf16, #tpu.memory_space<vmem>>, %arg5: memref<8x128xf32, #tpu.memory_space<vmem>>, %arg6: memref<256x128xf32, #tpu.memory_space<vmem>>) attributes {dimension_semantics = [#tpu.dimension_semantics<parallel>], iteration_bounds = array<i64: 4>, scalar_prefetch = 0 : i64, scratch_operands = 0 : i64, tpu.core_type = #tpu.core_type<tc>, window_params = [{transform_indices = @transform_0, window_bounds = array<i64: 256, 16>}, {pipeline_mode = #tpu.pipeline_mode<synchronous>, transform_indices = @transform_1, window_bounds = array<i64: 2, 16>}, {pipeline_mode = #tpu.pipeline_mode<synchronous>, transform_indices = @transform_2, window_bounds = array<i64: 16, 128>}, {pipeline_mode = #tpu.pipeline_mode<synchronous>, transform_indices = @transform_3, window_bounds = array<i64: 4, 128, 128>}, {pipeline_mode = #tpu.pipeline_mode<synchronous>, transform_indices = @transform_4, window_bounds = array<i64: 8, 128>}, {transform_indices = @transform_5, window_bounds = array<i64: 256, 128>}]} {
    %c0 = arith.constant 0 : index
    %c0_0 = arith.constant 0 : index
    %0 = vector.load %arg2[%c0, %c0_0] : memref<2x16xf32, #tpu.memory_space<vmem>>, vector<2x16xf32>
    %c0_1 = arith.constant 0 : index
    %c0_2 = arith.constant 0 : index
    %1 = vector.load %arg5[%c0_1, %c0_2] : memref<8x128xf32, #tpu.memory_space<vmem>>, vector<8x128xf32>
    %c0_3 = arith.constant 0 : index
    %c0_4 = arith.constant 0 : index
    %2 = vector.load %arg1[%c0_3, %c0_4] : memref<256x16xf32, #tpu.memory_space<vmem>>, vector<256x16xf32>
    %3 = vector.extract_strided_slice %0 {offsets = [0, 0], sizes = [1, 16], strides = [1, 1]} : vector<2x16xf32> to vector<1x16xf32>
    %4 = vector.shape_cast %3 : vector<1x16xf32> to vector<16xf32>
    %5 = vector.shape_cast %4 : vector<16xf32> to vector<1x16xf32>
    %6 = vector.broadcast %5 : vector<1x16xf32> to vector<256x16xf32>
    %7 = arith.mulf %2, %6 : vector<256x16xf32>
    %8 = vector.extract_strided_slice %0 {offsets = [1, 0], sizes = [1, 16], strides = [1, 1]} : vector<2x16xf32> to vector<1x16xf32>
    %9 = vector.shape_cast %8 : vector<1x16xf32> to vector<16xf32>
    %10 = vector.shape_cast %9 : vector<16xf32> to vector<1x16xf32>
    %11 = vector.broadcast %10 : vector<1x16xf32> to vector<256x16xf32>
    %12 = arith.addf %7, %11 : vector<256x16xf32>
    %cst = arith.constant 0.000000e+00 : f32
    %13 = vector.broadcast %cst : f32 to vector<256x16xf32>
    %14 = arith.maximumf %12, %13 : vector<256x16xf32>
    %15 = arith.truncf %14 : vector<256x16xf32> to vector<256x16xbf16>
    %c0_5 = arith.constant 0 : index
    %c0_6 = arith.constant 0 : index
    %16 = vector.load %arg3[%c0_5, %c0_6] : memref<16x128xbf16, #tpu.memory_space<vmem>>, vector<16x128xbf16>
    %cst_7 = arith.constant dense<0.000000e+00> : vector<256x128xf32>
    %17 = tpu.matmul %15, %16, %cst_7 {dimension_numbers = #tpu.dot_dimension_numbers<[1], [0], [0], [1], [0, 0, 1, 1], [], []>} : vector<256x16xbf16>, vector<16x128xbf16>, vector<256x128xf32> -> vector<256x128xf32>
    %18 = vector.extract_strided_slice %1 {offsets = [0, 0], sizes = [1, 128], strides = [1, 1]} : vector<8x128xf32> to vector<1x128xf32>
    %19 = vector.shape_cast %18 : vector<1x128xf32> to vector<128xf32>
    %20 = vector.shape_cast %19 : vector<128xf32> to vector<1x128xf32>
    %21 = vector.broadcast %20 : vector<1x128xf32> to vector<256x128xf32>
    %22 = arith.addf %17, %21 : vector<256x128xf32>
    %cst_8 = arith.constant 0.000000e+00 : f32
    %23 = vector.broadcast %cst_8 : f32 to vector<256x128xf32>
    %24 = arith.maximumf %22, %23 : vector<256x128xf32>
    %25 = arith.truncf %24 : vector<256x128xf32> to vector<256x128xbf16>
    %c0_9 = arith.constant 0 : index
    %c0_10 = arith.constant 0 : index
    %c0_11 = arith.constant 0 : index
    %26 = vector.load %arg4[%c0_9, %c0_10, %c0_11] : memref<4x128x128xbf16, #tpu.memory_space<vmem>>, vector<1x128x128xbf16>
    %27 = vector.shape_cast %26 : vector<1x128x128xbf16> to vector<128x128xbf16>
    %cst_12 = arith.constant dense<0.000000e+00> : vector<256x128xf32>
    %28 = tpu.matmul %25, %27, %cst_12 {dimension_numbers = #tpu.dot_dimension_numbers<[1], [0], [0], [1], [0, 0, 1, 1], [], []>} : vector<256x128xbf16>, vector<128x128xbf16>, vector<256x128xf32> -> vector<256x128xf32>
    %29 = vector.extract_strided_slice %1 {offsets = [1, 0], sizes = [1, 128], strides = [1, 1]} : vector<8x128xf32> to vector<1x128xf32>
    %30 = vector.shape_cast %29 : vector<1x128xf32> to vector<128xf32>
    %31 = vector.shape_cast %30 : vector<128xf32> to vector<1x128xf32>
    %32 = vector.broadcast %31 : vector<1x128xf32> to vector<256x128xf32>
    %33 = arith.addf %28, %32 : vector<256x128xf32>
    %cst_13 = arith.constant 0.000000e+00 : f32
    %34 = vector.broadcast %cst_13 : f32 to vector<256x128xf32>
    %35 = arith.maximumf %33, %34 : vector<256x128xf32>
    %36 = arith.truncf %35 : vector<256x128xf32> to vector<256x128xbf16>
    %c1 = arith.constant 1 : index
    %c0_14 = arith.constant 0 : index
    %c0_15 = arith.constant 0 : index
    %37 = vector.load %arg4[%c1, %c0_14, %c0_15] : memref<4x128x128xbf16, #tpu.memory_space<vmem>>, vector<1x128x128xbf16>
    %38 = vector.shape_cast %37 : vector<1x128x128xbf16> to vector<128x128xbf16>
    %cst_16 = arith.constant dense<0.000000e+00> : vector<256x128xf32>
    %39 = tpu.matmul %36, %38, %cst_16 {dimension_numbers = #tpu.dot_dimension_numbers<[1], [0], [0], [1], [0, 0, 1, 1], [], []>} : vector<256x128xbf16>, vector<128x128xbf16>, vector<256x128xf32> -> vector<256x128xf32>
    %40 = vector.extract_strided_slice %1 {offsets = [2, 0], sizes = [1, 128], strides = [1, 1]} : vector<8x128xf32> to vector<1x128xf32>
    %41 = vector.shape_cast %40 : vector<1x128xf32> to vector<128xf32>
    %42 = vector.shape_cast %41 : vector<128xf32> to vector<1x128xf32>
    %43 = vector.broadcast %42 : vector<1x128xf32> to vector<256x128xf32>
    %44 = arith.addf %39, %43 : vector<256x128xf32>
    %cst_17 = arith.constant 0.000000e+00 : f32
    %45 = vector.broadcast %cst_17 : f32 to vector<256x128xf32>
    %46 = arith.maximumf %44, %45 : vector<256x128xf32>
    %47 = arith.truncf %46 : vector<256x128xf32> to vector<256x128xbf16>
    %c2 = arith.constant 2 : index
    %c0_18 = arith.constant 0 : index
    %c0_19 = arith.constant 0 : index
    %48 = vector.load %arg4[%c2, %c0_18, %c0_19] : memref<4x128x128xbf16, #tpu.memory_space<vmem>>, vector<1x128x128xbf16>
    %49 = vector.shape_cast %48 : vector<1x128x128xbf16> to vector<128x128xbf16>
    %cst_20 = arith.constant dense<0.000000e+00> : vector<256x128xf32>
    %50 = tpu.matmul %47, %49, %cst_20 {dimension_numbers = #tpu.dot_dimension_numbers<[1], [0], [0], [1], [0, 0, 1, 1], [], []>} : vector<256x128xbf16>, vector<128x128xbf16>, vector<256x128xf32> -> vector<256x128xf32>
    %51 = vector.extract_strided_slice %1 {offsets = [3, 0], sizes = [1, 128], strides = [1, 1]} : vector<8x128xf32> to vector<1x128xf32>
    %52 = vector.shape_cast %51 : vector<1x128xf32> to vector<128xf32>
    %53 = vector.shape_cast %52 : vector<128xf32> to vector<1x128xf32>
    %54 = vector.broadcast %53 : vector<1x128xf32> to vector<256x128xf32>
    %55 = arith.addf %50, %54 : vector<256x128xf32>
    %cst_21 = arith.constant 0.000000e+00 : f32
    %56 = vector.broadcast %cst_21 : f32 to vector<256x128xf32>
    %57 = arith.maximumf %55, %56 : vector<256x128xf32>
    %58 = arith.truncf %57 : vector<256x128xf32> to vector<256x128xbf16>
    %c3 = arith.constant 3 : index
    %c0_22 = arith.constant 0 : index
    %c0_23 = arith.constant 0 : index
    %59 = vector.load %arg4[%c3, %c0_22, %c0_23] : memref<4x128x128xbf16, #tpu.memory_space<vmem>>, vector<1x128x128xbf16>
    %60 = vector.shape_cast %59 : vector<1x128x128xbf16> to vector<128x128xbf16>
    %cst_24 = arith.constant dense<0.000000e+00> : vector<256x128xf32>
    %61 = tpu.matmul %58, %60, %cst_24 {dimension_numbers = #tpu.dot_dimension_numbers<[1], [0], [0], [1], [0, 0, 1, 1], [], []>} : vector<256x128xbf16>, vector<128x128xbf16>, vector<256x128xf32> -> vector<256x128xf32>
    %62 = vector.extract_strided_slice %1 {offsets = [4, 0], sizes = [1, 128], strides = [1, 1]} : vector<8x128xf32> to vector<1x128xf32>
    %63 = vector.shape_cast %62 : vector<1x128xf32> to vector<128xf32>
    %64 = vector.shape_cast %63 : vector<128xf32> to vector<1x128xf32>
    %65 = vector.broadcast %64 : vector<1x128xf32> to vector<256x128xf32>
    %66 = arith.addf %61, %65 : vector<256x128xf32>
    %cst_25 = arith.constant 0.000000e+00 : f32
    %67 = vector.broadcast %cst_25 : f32 to vector<256x128xf32>
    %68 = arith.maximumf %66, %67 : vector<256x128xf32>
    %c0_26 = arith.constant 0 : index
    %c0_27 = arith.constant 0 : index
    %69 = vector.load %arg6[%c0_26, %c0_27] : memref<256x128xf32, #tpu.memory_space<vmem>>, vector<256x128xf32>
    tpu.vector_store %arg6[%c0_26, %c0_27], %68 {strides = array<i32>} : memref<256x128xf32, #tpu.memory_space<vmem>>, vector<256x128xf32>,
    return
  }
  func.func @transform_0(%arg0: i32) -> (i32, i32) {
    %c0_i32 = arith.constant 0 : i32
    %c0_i32_0 = arith.constant 0 : i32
    return %arg0, %c0_i32 : i32, i32
  }
  func.func @transform_1(%arg0: i32) -> (i32, i32) {
    %c0_i32 = arith.constant 0 : i32
    %c0_i32_0 = arith.constant 0 : i32
    %c0_i32_1 = arith.constant 0 : i32
    return %c0_i32, %c0_i32_0 : i32, i32
  }
  func.func @transform_2(%arg0: i32) -> (i32, i32) {
    %c0_i32 = arith.constant 0 : i32
    %c0_i32_0 = arith.constant 0 : i32
    %c0_i32_1 = arith.constant 0 : i32
    return %c0_i32, %c0_i32_0 : i32, i32
  }
  func.func @transform_3(%arg0: i32) -> (i32, i32, i32) {
    %c0_i32 = arith.constant 0 : i32
    %c0_i32_0 = arith.constant 0 : i32
    %c0_i32_1 = arith.constant 0 : i32
    %c0_i32_2 = arith.constant 0 : i32
    return %c0_i32, %c0_i32_0, %c0_i32_1 : i32, i32, i32
  }
  func.func @transform_4(%arg0: i32) -> (i32, i32) {
    %c0_i32 = arith.constant 0 : i32
    %c0_i32_0 = arith.constant 0 : i32
    %c0_i32_1 = arith.constant 0 : i32
    return %c0_i32, %c0_i32_0 : i32, i32
  }
  func.func @transform_5(%arg0: i32) -> (i32, i32) {
    %c0_i32 = arith.constant 0 : i32
    %c0_i32_0 = arith.constant 0 : i32
    return %arg0, %c0_i32 : i32, i32
  }
}

</mosaic_0001>

<bundles_post_ra>
// kernel: tpu_custom_call.1
= control target key start
LH: loop header
LB: loop body
LE: loop exit
PB: predicated region body
PF: predicated region fallthrough
CT: control target
= control target key end

     0   :  { %10 = vsyncpa [#allocation3], 0  ;;  %s3048_s0 = inlined_call_operand.vmem [shape: f32[1024,16], index: 0, kind: input, shape index: {}]   ;;  %s3049_s1 = inlined_call_operand.vmem [shape: f32[2,16], index: 1, kind: input, shape index: {}]   ;;  %s3050_s2 = inlined_call_operand.vmem [shape: bf16[16,128], index: 2, kind: input, shape index: {}]   ;;  %s3051_s3 = inlined_call_operand.vmem [shape: bf16[4,128,128], index: 3, kind: input, shape index: {}]   ;;  %s3052_s4 = inlined_call_operand.vmem [shape: f32[8,128], index: 4, kind: input, shape index: {}]   ;;  %s3053_s5 = inlined_call_operand.hbm [shape: f32[1024,128], index: 5, kind: output, shape index: {}]  }
   0x1   :  { %12 = vsyncpa [#allocation3 + $0x1], 0  ;;  %s2477_s18 = smov 0   ;;  %s2479_s19 = smov 0  }
   0x2   :  { %s2481_s20 = smov 0   ;;  %s2483_s21 = smov 0  }
   0x3 LB: > { %s2498_s22 = sadd.s32 4294967295, %s2442_s21   ;;  %s1854_s23 = sadd.s32 4294967294, %s2442_s21   ;;  %s2442_s21 = sphi %s2483_s21, %s3059_s21   ;;  %s2438_s20 = sphi %s2481_s20, %s3058_s20   ;;  %s2434_s19 = sphi %s2479_s19, %s3057_s19   ;;  %s2430_s18 = sphi %s2477_s18, %s3056_s18  }
   0x4   : > { %s2502_s24 = sadd.s32 1, %s2442_s21   ;;  %s135_s25 = sadd.s32 1, %s2438_s20 }
   0x5   : > { %s132_s26 = ssub.s32 %s2442_s21, %s2502_s24  ;;  %p145_p0 = scmp.ne.s32.totalorder %s2438_s20, %s2434_s19 }
   0x6   : > { %p133_p1 = scmp.eq.s32.totalorder %s132_s26, 0  ;;  %p146_p2 = scmp.eq.s32.totalorder %s2498_s22, 3 }
   0x7   : > { %p151_p3 = scmp.ne.s32.totalorder %s2434_s19, %s2430_s18  ;;  %p152_p4 = scmp.eq.s32.totalorder %s1854_s23, 3 }
   0x8   : > { %s2513_s27 = scalar_select %p133_p1, %s2438_s20, %s135_s25  }
   0x9   : > { %p2515_p5 = por %p146_p2, %p145_p0  ;;  %p2519_p6 = por %p152_p4, %p151_p3 }
   0xa   : > { %p1857_p7 = scmp.ge.s32.totalorder %s2442_s21, 1  ;;  %p191_p8 = scmp.lt.s32.totalorder %s2442_s21, 5 }
   0xc   : > { %p192_p9 = pnand %p1857_p7, %p191_p8 }
   0xd   : > { %v2346_v0 = vld [vmem:[%s3050_s2] sm:$0xff] (!%p192_p9)   ;;  %s1859_s7 = sshll.u32 (!%p192_p9), %s2498_s22, 5  ;;  %v261_v1 = vlaneseq (!%p192_p9)  ;;  %vm393_vm0 = vcmask (!%p192_p9), 130048   ;;  %s216_s16 = sand.u32 (!%p192_p9), 1, %s2434_s19  }
   0xe   : > { %195 = sbr.rel (%p192_p9) target bundleno = 1212 (0x4bc), region = 40  ;;  %p220_p10 = scmp.lt.s32.totalorder (!%p192_p9), %s1859_s7, 127  ;;  %v227_v2 = vld [vmem:[%s3049_s1] sm:$0x3] (!%p192_p9)  ;;  %2077 = vmatprep.subr.bf16.mxu0 (!%p192_p9), %v2346_v0  ;;  %2303 = vmatprep.subr.bf16.mxu1 (!%p192_p9), %v2346_v0 }
   0xf   : > { %v2532_v3 = vshrl.u32 (!%p192_p9), %v261_v1, 7  ;;  %v2537_v4 = vld [vmem:[%s3051_s3] sm:$0xff] (!%p192_p9)   ;;  %2078 = vmatpush3.bf16.msra.mxu0 (!%p192_p9), %v2346_v0  ;;  %2304 = vmatpush3.bf16.msra.mxu1 (!%p192_p9), %v2346_v0  ;;  %s1858_s25 = sshll.u32 (!%p192_p9), %s216_s16, 8  ;;  %s1963_s30 = sshll.u32 (!%p192_p9), %s2498_s22, 12 }
  0x10   : > { %2111 = vmatprep.subr.bf16.mxu1 (!%p192_p9), %v2537_v4  ;;  %s2934_s26 = scalar_lea.vmem (!%p192_p9), [#allocation2], %s1858_s25  ;;  %s2998_s9 = scalar_lea.hbm (!%p192_p9), %s3053_s5, %s1963_s30 }
  0x11   : > { %v263_v5 = vsub.s32 (!%p192_p9), 0, %v2532_v3  ;;  %v299_v6 = vsub.s32 (!%p192_p9), 1, %v2532_v3  ;;  %s1792_s6 = sshll.u32 (!%p192_p9), %s2934_s26, 4  ;;  %s3007_s22 = scalar_lea.sflag (!%p192_p9), [#allocation3], %s216_s16  ;;  %s3000_s6 = int_to_ptr.vmem [resolvable:$true] %s1792_s6 }
  0x12   : > { %s2380_s10 = scalar_lea.vmem (!%p192_p9), %s3000_s6, 4096  ;;  %s2444_s11 = smov (!%p192_p9), [#allocation2]  }
  0x13   : > { %v2549_v7 = vrot.slane (!%p192_p9), %v227_v2, %v263_v5  ;;  %v2553_v8 = vrot.slane (!%p192_p9), %v227_v2, %v299_v6  ;;  %p2381_p11 = scmp.ne.s32.totalorder (!%p192_p9), %s3000_s6, %s2380_s10 }
  0x15   : > { %s3061_s7 = smov (!%p220_p10, %s1859_s7), 127  ;;  %p2382_p12 = pnand %p2381_p11, %p2515_p5 }
  0x16   : > { %s1860_s12 = sshll.u32 %s3061_s7, 3 }
  0x17   : > { %s2545_s15 = scalar_lea.vmem %s3048_s0, %s1860_s12  ;;  %p2383_p13 = pneg %p2382_p12 }
  0x18   : > { %v229_v9 = vld [vmem:[%s2545_s15] sm:$0xff]  ;;  %v230_v10 = vld [vmem:[%s2545_s15 + $0x8] sm:$0xff]  ;;  %v231_v11 = vld [vmem:[%s2545_s15 + $0x10] sm:$0xff]  ;;  %s2384_s12 = sshll.u32 %s2444_s11, 4  ;;  %s2385_s12 = int_to_ptr.vmem [resolvable:$false] %s2384_s12 }
  0x19   : > { %v265_v12 = vmul.f32 %v2549_v7, %v229_v9  ;;  %v266_v13 = vmul.f32 %v2549_v7, %v230_v10  ;;  %v232_v14 = vld [vmem:[%s2545_s15 + $0x18] sm:$0xff]  ;;  %v267_v15 = vmul.f32 %v2549_v7, %v231_v11  ;;  %v233_v16 = vld [vmem:[%s2545_s15 + $0x20] sm:$0xff]  ;;  %v234_v17 = vld [vmem:[%s2545_s15 + $0x28] sm:$0xff]  ;;  %s2386_s13 = scalar_lea.vmem %s2385_s12, 8192  ;;  %p2387_p0 = scmp.lt.s32.totalorder %s3000_s6, %s2385_s12 }
  0x1a   : > { %v268_v18 = vmul.f32 %v2549_v7, %v232_v14  ;;  %v269_v19 = vmul.f32 %v2549_v7, %v233_v16  ;;  %v270_v20 = vmul.f32 %v2549_v7, %v234_v17  ;;  %v235_v21 = vld [vmem:[%s2545_s15 + $0x30] sm:$0xff]  ;;  %v236_v22 = vld [vmem:[%s2545_s15 + $0x38] sm:$0xff]  ;;  %v237_v31 = vld [vmem:[%s2545_s15 + $0x40] sm:$0xff]  ;;  %p2388_p1 = scmp.lt.s32.totalorder %s2386_s13, %s2380_s10 }
  0x1b   : > { %v301_v23 = vadd.f32 %v2553_v8, %v265_v12  ;;  %v302_v24 = vadd.f32 %v2553_v8, %v266_v13  ;;  %v303_v25 = vadd.f32 %v2553_v8, %v267_v15  ;;  %v271_v26 = vmul.f32 %v2549_v7, %v235_v21  ;;  %v238_v32 = vld [vmem:[%s2545_s15 + $0x48] sm:$0xff]  ;;  %v239_v37 = vld [vmem:[%s2545_s15 + $0x50] sm:$0xff]  ;;  %v240_v42 = vld [vmem:[%s2545_s15 + $0x58] sm:$0xff] }
  0x1c   : > { %v304_v27 = vadd.f32 %v2553_v8, %v268_v18  ;;  %v305_v28 = vadd.f32 %v2553_v8, %v269_v19  ;;  %v306_v29 = vadd.f32 %v2553_v8, %v270_v20  ;;  %v272_v30 = vmul.f32 %v2549_v7, %v236_v22  ;;  %v241_v43 = vld [vmem:[%s2545_s15 + $0x60] sm:$0xff]  ;;  %v242_v48 = vld [vmem:[%s2545_s15 + $0x68] sm:$0xff]  ;;  %v243_v49 = vld [vmem:[%s2545_s15 + $0x70] sm:$0xff]  ;;  %p2389_p2 = por %p2388_p1, %p2387_p0 }
  0x1d   : > { %v333_v33 = vmax.f32 %v301_v23, 0.0  ;;  %v334_v34 = vmax.f32 %v302_v24, 0.0  ;;  %v335_v35 = vmax.f32 %v303_v25, 0.0  ;;  %v307_v36 = vadd.f32 %v2553_v8, %v271_v26  ;;  %v244_v58 = vld [vmem:[%s2545_s15 + $0x78] sm:$0xff]  ;;  %v245_v59 = vld [vmem:[%s2545_s15 + $0x80] sm:$0xff]  ;;  %v246_v63 = vld [vmem:[%s2545_s15 + $0x88] sm:$0xff] }
  0x1e   : > { %v336_v38 = vmax.f32 %v304_v27, 0.0  ;;  %v337_v39 = vmax.f32 %v305_v28, 0.0  ;;  %v338_v40 = vmax.f32 %v306_v29, 0.0  ;;  %v308_v41 = vadd.f32 %v2553_v8, %v272_v30  ;;  %v247_v0 = vld [vmem:[%s2545_s15 + $0x90] sm:$0xff]  ;;  %v248_v11 = vld [vmem:[%s2545_s15 + $0x98] sm:$0xff]  ;;  %v249_v12 = vld [vmem:[%s2545_s15 + $0xa0] sm:$0xff]  ;;  %p2390_p3 = pnand %p2389_p2, %p2383_p13 }
  0x1f   : > { %v365_v44 = vpack.c.bf16 %v334_v34, %v333_v33  ;;  %v339_v45 = vmax.f32 %v307_v36, 0.0  ;;  %v273_v46 = vmul.f32 %v2549_v7, %v237_v31  ;;  %v274_v47 = vmul.f32 %v2549_v7, %v238_v32  ;;  %v250_v16 = vld [vmem:[%s2545_s15 + $0xa8] sm:$0xff]  ;;  %v251_v20 = vld [vmem:[%s2545_s15 + $0xb0] sm:$0xff]  ;;  %v252_v25 = vld [vmem:[%s2545_s15 + $0xb8] sm:$0xff] }
  0x20   : > { %v366_v50 = vpack.c.bf16 %v336_v38, %v335_v35  ;;  %v367_v51 = vpack.c.bf16 %v338_v40, %v337_v39  ;;  %v340_v52 = vmax.f32 %v308_v41, 0.0  ;;  %v275_v53 = vmul.f32 %v2549_v7, %v239_v37  ;;  %v253_v30 = vld [vmem:[%s2545_s15 + $0xc0] sm:$0xff]  ;;  %v254_v35 = vld [vmem:[%s2545_s15 + $0xc8] sm:$0xff]  ;;  %v255_v40 = vld [vmem:[%s2545_s15 + $0xd0] sm:$0xff] }
  0x21   : > { %2079 = vmatprep.mubr.msk.bf16.mxu0 %vm393_vm0, %v365_v44  ;;  %v309_v54 = vadd.f32 %v2553_v8, %v273_v46  ;;  %v310_v55 = vadd.f32 %v2553_v8, %v274_v47  ;;  %v276_v56 = vmul.f32 %v2549_v7, %v240_v42  ;;  %v277_v57 = vmul.f32 %v2549_v7, %v241_v43 }
  0x22   : > { %2080 = vmatmul.mubr.msk.bf16.vlgmr.msra.gmra.mrb[0].mxu0 %vm393_vm0, %v366_v50  ;;  %v311_v60 = vadd.f32 %v2553_v8, %v275_v53  ;;  %v278_v61 = vmul.f32 %v2549_v7, %v242_v48  ;;  %v279_v62 = vmul.f32 %v2549_v7, %v243_v49  ;;  %v280_v15 = vmul.f32 %v2549_v7, %v244_v58  ;;  %v2348_v50 = vld [vmem:[%s3051_s3 + $0x8] sm:$0xff]  }
  0x23   : > { %2083 = vmatprep.mubr.msk.bf16.mxu0 %vm393_vm0, %v367_v51  ;;  %v341_v1 = vmax.f32 %v309_v54, 0.0  ;;  %v342_v2 = vmax.f32 %v310_v55, 0.0  ;;  %v312_v9 = vadd.f32 %v2553_v8, %v276_v56  ;;  %v313_v10 = vadd.f32 %v2553_v8, %v277_v57  ;;  %v257_v55 = vld [vmem:[%s2545_s15 + $0xe0] sm:$0xff] }
  0x24   : > { %v343_v13 = vmax.f32 %v311_v60, 0.0  ;;  %v314_v14 = vadd.f32 %v2553_v8, %v278_v61  ;;  %v368_v17 = vpack.c.bf16 %v340_v52, %v339_v45  ;;  %v281_v19 = vmul.f32 %v2549_v7, %v245_v59  ;;  %v256_v45 = vld [vmem:[%s2545_s15 + $0xd8] sm:$0xff]  ;;  %v258_v60 = vld [vmem:[%s2545_s15 + $0xe8] sm:$0xff] }
  0x25   : > { %v344_v18 = vmax.f32 %v312_v9, 0.0  ;;  %v345_v21 = vmax.f32 %v313_v10, 0.0  ;;  %v2613_v23 = vadd.f32 %v2553_v8, %v279_v62  ;;  %v282_v24 = vmul.f32 %v2549_v7, %v246_v63 }
  0x26   : > { %v346_v22 = vmax.f32 %v314_v14, 0.0  ;;  %v369_v26 = vpack.c.bf16 %v342_v2, %v341_v1  ;;  %v317_v27 = vadd.f32 %v2553_v8, %v281_v19  ;;  %v283_v28 = vmul.f32 %v2549_v7, %v247_v0 }
  0x27   : > { %v284_v29 = vmul.f32 %v2549_v7, %v248_v11  ;;  %v370_v31 = vpack.c.bf16 %v344_v18, %v343_v13  ;;  %v2622_v32 = vadd.f32 %v2553_v8, %v280_v15  ;;  %v318_v33 = vadd.f32 %v2553_v8, %v282_v24 }
  0x28   : > { %v285_v34 = vmul.f32 %v2549_v7, %v249_v12  ;;  %v349_v36 = vmax.f32 %v317_v27, 0.0  ;;  %v319_v37 = vadd.f32 %v2553_v8, %v283_v28  ;;  %v286_v39 = vmul.f32 %v2549_v7, %v250_v16  ;;  %v2349_v16 = vld [vmem:[%s3051_s3 + $0x10] sm:$0xff]  }
  0x29   : > { %v320_v38 = vadd.f32 %v2553_v8, %v284_v29  ;;  %v371_v41 = vpack.c.bf16 %v346_v22, %v345_v21  ;;  %v350_v42 = vmax.f32 %v318_v33, 0.0  ;;  %v287_v44 = vmul.f32 %v2549_v7, %v251_v20  ;;  %v259_v21 = vld [vmem:[%s2545_s15 + $0xf0] sm:$0xff]  ;;  %v2350_v22 = vld [vmem:[%s3051_s3 + $0x18] sm:$0xff]  }
  0x2a   : > { %2084 = vmatmul.mubr.msk.bf16.gmra.mrb[4].mxu0 %vm393_vm0, %v368_v17  ;;  %v321_v43 = vadd.f32 %v2553_v8, %v285_v34  ;;  %v351_v46 = vmax.f32 %v319_v37, 0.0  ;;  %v322_v48 = vadd.f32 %v2553_v8, %v286_v39  ;;  %v288_v49 = vmul.f32 %v2549_v7, %v252_v25  ;;  %v260_v25 = vld [vmem:[%s2545_s15 + $0xf8] sm:$0xff] }
  0x2b   : > { %2087 = vmatprep.mubr.msk.bf16.mxu0 %vm393_vm0, %v369_v26  ;;  %v352_v47 = vmax.f32 %v320_v38, 0.0  ;;  %v373_v51 = vpack.c.bf16 %v350_v42, %v349_v36  ;;  %v323_v53 = vadd.f32 %v2553_v8, %v287_v44  ;;  %v289_v54 = vmul.f32 %v2549_v7, %v253_v30  ;;  %v2356_v42 = vld [vmem:[%s3051_s3 + $0x48] sm:$0xff]   ;;  %v2358_v44 = vld [vmem:[%s3051_s3 + $0x58] sm:$0xff]  }
  0x2c   : > { %v353_v52 = vmax.f32 %v321_v43, 0.0  ;;  %v354_v57 = vmax.f32 %v322_v48, 0.0  ;;  %v324_v58 = vadd.f32 %v2553_v8, %v288_v49  ;;  %v290_v59 = vmul.f32 %v2549_v7, %v254_v35  ;;  %v2357_v43 = vld [vmem:[%s3051_s3 + $0x50] sm:$0xff]  }
  0x2d   : > { %v374_v56 = vpack.c.bf16 %v352_v47, %v351_v46  ;;  %2095 = vmatprep.mubr.msk.bf16.mxu1 %vm393_vm0, %v373_v51  ;;  %v355_v61 = vmax.f32 %v323_v53, 0.0  ;;  %v325_v62 = vadd.f32 %v2553_v8, %v289_v54  ;;  %v291_v63 = vmul.f32 %v2549_v7, %v255_v40  ;;  %v2354_v40 = vld [vmem:[%s3051_s3 + $0x38] sm:$0xff]   ;;  %v2360_v46 = vld [vmem:[%s3051_s3 + $0x68] sm:$0xff]   ;;  %v2716_v47 = vld [vmem:[%s3052_s4] sm:$0xff] }
  0x2e   : > { %v292_v0 = vmul.f32 %v2549_v7, %v256_v45  ;;  %v375_v1 = vpack.c.bf16 %v354_v57, %v353_v52  ;;  %v356_v2 = vmax.f32 %v324_v58, 0.0  ;;  %v326_v9 = vadd.f32 %v2553_v8, %v290_v59  ;;  %v2359_v45 = vld [vmem:[%s3051_s3 + $0x60] sm:$0xff]  }
  0x2f   : > { %2096 = vmatmul.mubr.msk.bf16.vlgmr.msra.gmra.mrb[0].mxu1 %vm393_vm0, %v374_v56  ;;  %v293_v10 = vmul.f32 %v2549_v7, %v257_v55  ;;  %v357_v11 = vmax.f32 %v325_v62, 0.0  ;;  %v294_v12 = vmul.f32 %v2549_v7, %v258_v60  ;;  %v327_v14 = vadd.f32 %v2553_v8, %v291_v63 }
  0x30   : > { %2112 = vmatpush3.bf16.msra.mxu1 %v2537_v4  ;;  %2099 = vmatprep.mubr.msk.bf16.mxu1 %vm393_vm0, %v375_v1  ;;  %v358_v13 = vmax.f32 %v326_v9, 0.0  ;;  %v328_v15 = vadd.f32 %v2553_v8, %v292_v0  ;;  %v347_v17 = vmax.f32 %v2613_v23, 0.0  ;;  %v348_v18 = vmax.f32 %v2622_v32, 0.0  ;;  %v2351_v32 = vld [vmem:[%s3051_s3 + $0x20] sm:$0xff]  }
  0x31   : > { %2113 = vmatprep.subr.bf16.mxu1 %v2348_v50  ;;  %v329_v4 = vadd.f32 %v2553_v8, %v293_v10  ;;  %v330_v19 = vadd.f32 %v2553_v8, %v294_v12  ;;  %v376_v20 = vpack.c.bf16 %v356_v2, %v355_v61  ;;  %v359_v26 = vmax.f32 %v327_v14, 0.0 }
  0x32   : > { %2088 = vmatmul.mubr.msk.bf16.gmra.mrb[8].mxu0 %vm393_vm0, %v370_v31  ;;  %v377_v24 = vpack.c.bf16 %v358_v13, %v357_v11  ;;  %v360_v27 = vmax.f32 %v328_v15, 0.0  ;;  %v372_v23 = vpack.c.bf16 %v348_v18, %v347_v17  ;;  %v295_v30 = vmul.f32 %v2549_v7, %v259_v21 }
  0x33   : > { %2091 = vmatprep.mubr.msk.bf16.mxu0 %vm393_vm0, %v371_v41  ;;  %v361_v28 = vmax.f32 %v329_v4, 0.0  ;;  %v362_v29 = vmax.f32 %v330_v19, 0.0  ;;  %v296_v31 = vmul.f32 %v2549_v7, %v260_v25  ;;  %v2352_v7 = vld [vmem:[%s3051_s3 + $0x28] sm:$0xff]   ;;  %v2355_v41 = vld [vmem:[%s3051_s3 + $0x40] sm:$0xff]   ;;  %v2721_v48 = vrot.slane %v2716_v47, %v263_v5 }
  0x34   : > { %2114 = vmatpush3.bf16.msra.mxu1 %v2348_v50  ;;  %v378_v33 = vpack.c.bf16 %v360_v27, %v359_v26  ;;  %v331_v34 = vadd.f32 %v2553_v8, %v295_v30  ;;  %2159 = vmatprep.subr.bf16.mxu0 %v2355_v41 }
  0x35   : > { %2115 = vmatprep.subr.bf16.mxu1 %v2349_v16  ;;  %v332_v35 = vadd.f32 %v2553_v8, %v296_v31  ;;  %v379_v36 = vpack.c.bf16 %v362_v29, %v361_v28  ;;  %v2353_v8 = vld [vmem:[%s3051_s3 + $0x30] sm:$0xff]   ;;  %2160 = vmatpush3.bf16.msra.mxu0 %v2355_v41 }
  0x36   : > { %v363_v37 = vmax.f32 %v331_v34, 0.0  ;;  %2161 = vmatprep.subr.bf16.mxu0 %v2356_v42 }
  0x37   : > { %2100 = vmatmul.mubr.msk.bf16.gmra.mrb[4].mxu1 %vm393_vm0, %v376_v20  ;;  %v364_v38 = vmax.f32 %v332_v35, 0.0 }
  0x38   : > { %2103 = vmatprep.mubr.msk.bf16.mxu1 %vm393_vm0, %v377_v24  ;;  %2116 = vmatpush3.bf16.msra.mxu1 %v2349_v16 }
  0x39   : > { %2117 = vmatprep.subr.bf16.mxu1 %v2350_v22  ;;  %v380_v39 = vpack.c.bf16 %v364_v38, %v363_v37  ;;  %2162 = vmatpush3.bf16.msra.mxu0 %v2356_v42 }
  0x3a   : > { %2092 = vmatmul.mubr.msk.bf16.gmra.mrb[12].mxu0 %vm393_vm0, %v372_v23  ;;  %2163 = vmatprep.subr.bf16.mxu0 %v2357_v43 }
  0x3c   : > { %2118 = vmatpush3.bf16.msra.mxu1 %v2350_v22 }
  0x3d   : > { %2119 = vmatprep.subr.bf16.mxu1 %v2351_v32  ;;  %2164 = vmatpush3.bf16.msra.mxu0 %v2357_v43 }
  0x3e   : > { %2165 = vmatprep.subr.bf16.mxu0 %v2358_v44 }
  0x3f   : > { %2104 = vmatmul.mubr.msk.bf16.gmra.mrb[8].mxu1 %vm393_vm0, %v378_v33 }
  0x40   : > { %2107 = vmatprep.mubr.msk.bf16.mxu1 %vm393_vm0, %v379_v36  ;;  %2120 = vmatpush3.bf16.msra.mxu1 %v2351_v32 }
  0x41   : > { %2121 = vmatprep.subr.bf16.mxu1 %v2352_v7  ;;  %2166 = vmatpush3.bf16.msra.mxu0 %v2358_v44 }
  0x42   : > { %2167 = vmatprep.subr.bf16.mxu0 %v2359_v45 }
  0x44   : > { %2122 = vmatpush3.bf16.msra.mxu1 %v2352_v7 }
  0x45   : > { %2123 = vmatprep.subr.bf16.mxu1 %v2353_v8  ;;  %2168 = vmatpush3.bf16.msra.mxu0 %v2359_v45 }
  0x46   : > { %2169 = vmatprep.subr.bf16.mxu0 %v2360_v46 }
  0x47   : > { %2108 = vmatmul.mubr.msk.bf16.gmra.mrb[12].mxu1 %vm393_vm0, %v380_v39 }
  0x48   : > { %2124 = vmatpush3.bf16.msra.mxu1 %v2353_v8 }
  0x49   : > { %2125 = vmatprep.subr.bf16.mxu1 %v2354_v40  ;;  %2170 = vmatpush3.bf16.msra.mxu0 %v2360_v46 }
  0x4c   : > { %2126 = vmatpush3.bf16.msra.mxu1 %v2354_v40 }
  0xf5   : > { %v2081_v49 = vpop.f32.mrb[0].mxu0 }
  0xf6   : > { %v485_v50 = vadd.f32 %v2081_v49, %v2721_v48  ;;  %v476_v51 = vpop.f32.mrb[1].mxu0 }
  0xf7   : > { %v477_v52 = vadd.f32 %v476_v51, %v2721_v48  ;;  %v2082_v53 = vpop.f32.mrb[2].mxu0 }
  0xf8   : > { %v488_v54 = vadd.f32 %v2082_v53, %v2721_v48  ;;  %v479_v55 = vpop.f32.mrb[3].mxu0  ;;  %v605_v57 = vmax.f32 %v485_v50, 0.0 }
  0xf9   : > { %v480_v56 = vadd.f32 %v479_v55, %v2721_v48  ;;  %v603_v59 = vmax.f32 %v477_v52, 0.0 }
  0xfa   : > { %v606_v58 = vmax.f32 %v488_v54, 0.0 }
  0xfb   : > { %v604_v60 = vmax.f32 %v480_v56, 0.0 }
  0xfc   : > { %v636_v61 = vpack.c.bf16 %v606_v58, %v605_v57 }
  0xfd   : > { %v635_v62 = vpack.c.bf16 %v604_v60, %v603_v59  ;;  %v2085_v5 = vpop.f32.mrb[4].mxu0 }
  0xfe   : > { %v501_v63 = vadd.f32 %v2085_v5, %v2721_v48  ;;  %v492_v0 = vpop.f32.mrb[5].mxu0 }
  0xff   : > { %v493_v1 = vadd.f32 %v492_v0, %v2721_v48  ;;  %v2086_v2 = vpop.f32.mrb[6].mxu0  ;;  %2127 = vmatprep.mubr.bf16.mxu1 %v635_v62 }
 0x100   : > { %v504_v9 = vadd.f32 %v2086_v2, %v2721_v48  ;;  %v495_v10 = vpop.f32.mrb[7].mxu0  ;;  %2128 = vmatmul.mubr.bf16.vlgmr.msra.gmra.mrb[16].mxu1 %v636_v61  ;;  %v609_v12 = vmax.f32 %v501_v63, 0.0 }
 0x101   : > { %v496_v11 = vadd.f32 %v495_v10, %v2721_v48  ;;  %v607_v15 = vmax.f32 %v493_v1, 0.0 }
 0x102   : > { %v610_v13 = vmax.f32 %v504_v9, 0.0  ;;  %v2097_v14 = vpop.f32.mrb[0].mxu1 }
 0x103   : > { %v608_v16 = vmax.f32 %v496_v11, 0.0  ;;  %v549_v17 = vadd.f32 %v2097_v14, %v2721_v48  ;;  %v540_v18 = vpop.f32.mrb[1].mxu1 }
 0x104   : > { %v638_v4 = vpack.c.bf16 %v610_v13, %v609_v12  ;;  %v541_v19 = vadd.f32 %v540_v18, %v2721_v48  ;;  %v2098_v20 = vpop.f32.mrb[2].mxu1 }
 0x105   : > { %v637_v21 = vpack.c.bf16 %v608_v16, %v607_v15  ;;  %v2089_v22 = vpop.f32.mrb[8].mxu0  ;;  %v621_v24 = vmax.f32 %v549_v17, 0.0  ;;  %v552_v25 = vadd.f32 %v2098_v20, %v2721_v48  ;;  %v543_v26 = vpop.f32.mrb[3].mxu1 }
 0x106   : > { %v517_v27 = vadd.f32 %v2089_v22, %v2721_v48  ;;  %v508_v23 = vpop.f32.mrb[9].mxu0  ;;  %v619_v28 = vmax.f32 %v541_v19, 0.0  ;;  %v544_v29 = vadd.f32 %v543_v26, %v2721_v48 }
 0x107   : > { %v509_v30 = vadd.f32 %v508_v23, %v2721_v48  ;;  %v2090_v31 = vpop.f32.mrb[10].mxu0  ;;  %2131 = vmatprep.mubr.bf16.mxu1 %v637_v21  ;;  %v622_v32 = vmax.f32 %v552_v25, 0.0 }
 0x108   : > { %v520_v33 = vadd.f32 %v2090_v31, %v2721_v48  ;;  %v511_v34 = vpop.f32.mrb[11].mxu0  ;;  %2132 = vmatmul.mubr.bf16.gmra.mrb[20].mxu1 %v638_v4  ;;  %v620_v35 = vmax.f32 %v544_v29, 0.0  ;;  %v613_v37 = vmax.f32 %v517_v27, 0.0 }
 0x109   : > { %v512_v36 = vadd.f32 %v511_v34, %v2721_v48  ;;  %v2739_v7 = vpack.c.bf16 %v622_v32, %v621_v24  ;;  %v611_v40 = vmax.f32 %v509_v30, 0.0 }
 0x10a   : > { %v614_v38 = vmax.f32 %v520_v33, 0.0  ;;  %v643_v39 = vpack.c.bf16 %v620_v35, %v619_v28  ;;  %v2101_v8 = vpop.f32.mrb[4].mxu1 }
 0x10b   : > { %v612_v41 = vmax.f32 %v512_v36, 0.0  ;;  %v565_v42 = vadd.f32 %v2101_v8, %v2721_v48  ;;  %v556_v43 = vpop.f32.mrb[5].mxu1 }
 0x10c   : > { %v640_v44 = vpack.c.bf16 %v614_v38, %v613_v37  ;;  %v557_v45 = vadd.f32 %v556_v43, %v2721_v48  ;;  %v2102_v46 = vpop.f32.mrb[6].mxu1  ;;  %v2366_v43 = vld [vmem:[%s3051_s3 + $0x98] sm:$0xff]  }
 0x10d   : > { %v639_v49 = vpack.c.bf16 %v612_v41, %v611_v40  ;;  %v2093_v50 = vpop.f32.mrb[12].mxu0  ;;  %v625_v51 = vmax.f32 %v565_v42, 0.0  ;;  %v568_v52 = vadd.f32 %v2102_v46, %v2721_v48  ;;  %v559_v53 = vpop.f32.mrb[7].mxu1  ;;  %v2361_v40 = vld [vmem:[%s3051_s3 + $0x70] sm:$0xff]   ;;  %v2364_v41 = vld [vmem:[%s3051_s3 + $0x88] sm:$0xff]  }
 0x10e   : > { %v533_v54 = vadd.f32 %v2093_v50, %v2721_v48  ;;  %v524_v55 = vpop.f32.mrb[13].mxu0  ;;  %v623_v56 = vmax.f32 %v557_v45, 0.0  ;;  %v560_v57 = vadd.f32 %v559_v53, %v2721_v48  ;;  %2171 = vmatprep.subr.bf16.mxu0 %v2361_v40  ;;  %v2365_v42 = vld [vmem:[%s3051_s3 + $0x90] sm:$0xff]   ;;  %v2368_v45 = vld [vmem:[%s3051_s3 + $0xa8] sm:$0xff]  }
 0x10f   : > { %v525_v58 = vadd.f32 %v524_v55, %v2721_v48  ;;  %v2094_v59 = vpop.f32.mrb[14].mxu0  ;;  %2135 = vmatprep.mubr.bf16.mxu1 %v639_v49  ;;  %v626_v60 = vmax.f32 %v568_v52, 0.0  ;;  %2172 = vmatpush3.bf16.msra.mxu0 %v2361_v40  ;;  %v2369_v46 = vld [vmem:[%s3051_s3 + $0xb0] sm:$0xff]   ;;  %v2788_v49 = vrot.slane %v2716_v47, %v299_v6 }
 0x110   : > { %v536_v61 = vadd.f32 %v2094_v59, %v2721_v48  ;;  %v527_v62 = vpop.f32.mrb[15].mxu0  ;;  %2136 = vmatmul.mubr.bf16.gmra.mrb[24].mxu1 %v640_v44  ;;  %v624_v5 = vmax.f32 %v560_v57, 0.0  ;;  %v617_v1 = vmax.f32 %v533_v54, 0.0  ;;  %v2367_v44 = vld [vmem:[%s3051_s3 + $0xa0] sm:$0xff]  }
 0x111   : > { %v528_v63 = vadd.f32 %v527_v62, %v2721_v48  ;;  %v646_v0 = vpack.c.bf16 %v626_v60, %v625_v51  ;;  %v615_v11 = vmax.f32 %v525_v58, 0.0 }
 0x112   : > { %v618_v2 = vmax.f32 %v536_v61, 0.0  ;;  %v645_v9 = vpack.c.bf16 %v624_v5, %v623_v56  ;;  %v2105_v10 = vpop.f32.mrb[8].mxu1 }
 0x113   : > { %v616_v12 = vmax.f32 %v528_v63, 0.0  ;;  %v581_v13 = vadd.f32 %v2105_v10, %v2721_v48  ;;  %v572_v14 = vpop.f32.mrb[9].mxu1 }
 0x114   : > { %v642_v15 = vpack.c.bf16 %v618_v2, %v617_v1  ;;  %v573_v16 = vadd.f32 %v572_v14, %v2721_v48  ;;  %v2106_v17 = vpop.f32.mrb[10].mxu1 }
 0x115   : > { %v641_v18 = vpack.c.bf16 %v616_v12, %v615_v11  ;;  %v629_v4 = vmax.f32 %v581_v13, 0.0  ;;  %v584_v19 = vadd.f32 %v2106_v17, %v2721_v48  ;;  %v575_v20 = vpop.f32.mrb[11].mxu1 }
 0x116   : > { %v627_v21 = vmax.f32 %v573_v16, 0.0  ;;  %v576_v22 = vadd.f32 %v575_v20, %v2721_v48 }
 0x117   : > { %2139 = vmatprep.mubr.bf16.mxu1 %v641_v18  ;;  %v630_v24 = vmax.f32 %v584_v19, 0.0 }
 0x118   : > { %2140 = vmatmul.mubr.bf16.gmra.mrb[28].mxu1 %v642_v15  ;;  %v628_v25 = vmax.f32 %v576_v22, 0.0 }
 0x119   : > { %2143 = vmatprep.mubr.bf16.mxu1 %v643_v39  ;;  %v648_v26 = vpack.c.bf16 %v630_v24, %v629_v4 }
 0x11a   : > { %v647_v27 = vpack.c.bf16 %v628_v25, %v627_v21  ;;  %v2109_v23 = vpop.f32.mrb[12].mxu1 }
 0x11b   : > { %v597_v28 = vadd.f32 %v2109_v23, %v2721_v48  ;;  %v588_v29 = vpop.f32.mrb[13].mxu1 }
 0x11c   : > { %v589_v30 = vadd.f32 %v588_v29, %v2721_v48  ;;  %v2110_v31 = vpop.f32.mrb[14].mxu1 }
 0x11d   : > { %v633_v32 = vmax.f32 %v597_v28, 0.0  ;;  %v600_v33 = vadd.f32 %v2110_v31, %v2721_v48  ;;  %v591_v34 = vpop.f32.mrb[15].mxu1 }
 0x11e   : > { %v631_v35 = vmax.f32 %v589_v30, 0.0  ;;  %v592_v36 = vadd.f32 %v591_v34, %v2721_v48  ;;  %v2362_v48 = vld [vmem:[%s3051_s3 + $0x78] sm:$0xff]  }
 0x11f   : > { %v634_v37 = vmax.f32 %v600_v33, 0.0  ;;  %2173 = vmatprep.subr.bf16.mxu0 %v2362_v48 }
 0x120   : > { %2144 = vmatmul.mubr.bf16.gmra.mrb[32].mxu1 %v2739_v7  ;;  %v632_v38 = vmax.f32 %v592_v36, 0.0  ;;  %2174 = vmatpush3.bf16.msra.mxu0 %v2362_v48  ;;  %v2363_v7 = vld [vmem:[%s3051_s3 + $0x80] sm:$0xff]  }
 0x121   : > { %2147 = vmatprep.mubr.bf16.mxu1 %v645_v9  ;;  %v650_v39 = vpack.c.bf16 %v634_v37, %v633_v32  ;;  %2207 = vmatprep.subr.bf16.mxu1 %v2363_v7 }
 0x122   : > { %v649_v8 = vpack.c.bf16 %v632_v38, %v631_v35  ;;  %2208 = vmatpush3.bf16.msra.mxu1 %v2363_v7 }
 0x123   : > { %2209 = vmatprep.subr.bf16.mxu1 %v2364_v41 }
 0x126   : > { %2210 = vmatpush3.bf16.msra.mxu1 %v2364_v41 }
 0x127   : > { %2211 = vmatprep.subr.bf16.mxu1 %v2365_v42 }
 0x128   : > { %2148 = vmatmul.mubr.bf16.gmra.mrb[36].mxu1 %v646_v0 }
 0x129   : > { %2151 = vmatprep.mubr.bf16.mxu1 %v647_v27 }
 0x12a   : > { %2212 = vmatpush3.bf16.msra.mxu1 %v2365_v42 }
 0x12b   : > { %2213 = vmatprep.subr.bf16.mxu1 %v2366_v43 }
 0x12e   : > { %2214 = vmatpush3.bf16.msra.mxu1 %v2366_v43 }
 0x12f   : > { %2215 = vmatprep.subr.bf16.mxu1 %v2367_v44 }
 0x130   : > { %2152 = vmatmul.mubr.bf16.gmra.mrb[40].mxu1 %v648_v26 }
 0x131   : > { %2155 = vmatprep.mubr.bf16.mxu1 %v649_v8 }
 0x132   : > { %2216 = vmatpush3.bf16.msra.mxu1 %v2367_v44 }
 0x133   : > { %2217 = vmatprep.subr.bf16.mxu1 %v2368_v45 }
 0x136   : > { %2218 = vmatpush3.bf16.msra.mxu1 %v2368_v45 }
 0x137   : > { %2219 = vmatprep.subr.bf16.mxu1 %v2369_v46 }
 0x138   : > { %2156 = vmatmul.mubr.bf16.gmra.mrb[44].mxu1 %v650_v39 }
 0x13a   : > { %2220 = vmatpush3.bf16.msra.mxu1 %v2369_v46 }
 0x1d3   : > { %v2129_v50 = vpop.f32.mrb[16].mxu1 }
 0x1d4   : > { %v762_v51 = vadd.f32 %v2129_v50, %v2788_v49  ;;  %v753_v52 = vpop.f32.mrb[17].mxu1 }
 0x1d5   : > { %v754_v53 = vadd.f32 %v753_v52, %v2788_v49  ;;  %v2130_v54 = vpop.f32.mrb[18].mxu1 }
 0x1d6   : > { %v765_v55 = vadd.f32 %v2130_v54, %v2788_v49  ;;  %v756_v56 = vpop.f32.mrb[19].mxu1  ;;  %v882_v58 = vmax.f32 %v762_v51, 0.0 }
 0x1d7   : > { %v757_v57 = vadd.f32 %v756_v56, %v2788_v49  ;;  %v880_v60 = vmax.f32 %v754_v53, 0.0 }
 0x1d8   : > { %v883_v59 = vmax.f32 %v765_v55, 0.0 }
 0x1d9   : > { %v881_v61 = vmax.f32 %v757_v57, 0.0 }
 0x1da   : > { %v913_v62 = vpack.c.bf16 %v883_v59, %v882_v58 }
 0x1db   : > { %v912_v5 = vpack.c.bf16 %v881_v61, %v880_v60  ;;  %v2133_v6 = vpop.f32.mrb[20].mxu1 }
 0x1dc   : > { %v778_v63 = vadd.f32 %v2133_v6, %v2788_v49  ;;  %v769_v0 = vpop.f32.mrb[21].mxu1 }
 0x1dd   : > { %v770_v1 = vadd.f32 %v769_v0, %v2788_v49  ;;  %v2134_v2 = vpop.f32.mrb[22].mxu1  ;;  %2175 = vmatprep.mubr.bf16.mxu0 %v912_v5 }
 0x1de   : > { %v781_v9 = vadd.f32 %v2134_v2, %v2788_v49  ;;  %v772_v10 = vpop.f32.mrb[23].mxu1  ;;  %2176 = vmatmul.mubr.bf16.vlgmr.msra.gmra.mrb[16].mxu0 %v913_v62  ;;  %v886_v12 = vmax.f32 %v778_v63, 0.0 }
 0x1df   : > { %v773_v11 = vadd.f32 %v772_v10, %v2788_v49  ;;  %v884_v14 = vmax.f32 %v770_v1, 0.0 }
 0x1e0   : > { %v887_v13 = vmax.f32 %v781_v9, 0.0 }
 0x1e1   : > { %v885_v15 = vmax.f32 %v773_v11, 0.0 }
 0x1e2   : > { %v915_v16 = vpack.c.bf16 %v887_v13, %v886_v12 }
 0x1e3   : > { %v914_v17 = vpack.c.bf16 %v885_v15, %v884_v14  ;;  %v2137_v18 = vpop.f32.mrb[24].mxu1 }
 0x1e4   : > { %v794_v4 = vadd.f32 %v2137_v18, %v2788_v49  ;;  %v785_v19 = vpop.f32.mrb[25].mxu1 }
 0x1e5   : > { %v786_v20 = vadd.f32 %v785_v19, %v2788_v49  ;;  %v2138_v21 = vpop.f32.mrb[26].mxu1  ;;  %2179 = vmatprep.mubr.bf16.mxu0 %v914_v17 }
 0x1e6   : > { %v797_v22 = vadd.f32 %v2138_v21, %v2788_v49  ;;  %v788_v24 = vpop.f32.mrb[27].mxu1  ;;  %2180 = vmatmul.mubr.bf16.gmra.mrb[20].mxu0 %v915_v16  ;;  %v890_v26 = vmax.f32 %v794_v4, 0.0 }
 0x1e7   : > { %v789_v25 = vadd.f32 %v788_v24, %v2788_v49  ;;  %v888_v23 = vmax.f32 %v786_v20, 0.0 }
 0x1e8   : > { %v891_v27 = vmax.f32 %v797_v22, 0.0 }
 0x1e9   : > { %v889_v28 = vmax.f32 %v789_v25, 0.0 }
 0x1ea   : > { %v917_v29 = vpack.c.bf16 %v891_v27, %v890_v26 }
 0x1eb   : > { %v916_v30 = vpack.c.bf16 %v889_v28, %v888_v23  ;;  %v2141_v31 = vpop.f32.mrb[28].mxu1 }
 0x1ec   : > { %v810_v32 = vadd.f32 %v2141_v31, %v2788_v49  ;;  %v801_v33 = vpop.f32.mrb[29].mxu1 }
 0x1ed   : > { %v802_v34 = vadd.f32 %v801_v33, %v2788_v49  ;;  %v2142_v35 = vpop.f32.mrb[30].mxu1  ;;  %2183 = vmatprep.mubr.bf16.mxu0 %v916_v30 }
 0x1ee   : > { %v813_v36 = vadd.f32 %v2142_v35, %v2788_v49  ;;  %v804_v37 = vpop.f32.mrb[31].mxu1  ;;  %2184 = vmatmul.mubr.bf16.gmra.mrb[24].mxu0 %v917_v29  ;;  %v894_v39 = vmax.f32 %v810_v32, 0.0 }
 0x1ef   : > { %v805_v38 = vadd.f32 %v804_v37, %v2788_v49  ;;  %v892_v40 = vmax.f32 %v802_v34, 0.0 }
 0x1f0   : > { %v895_v8 = vmax.f32 %v813_v36, 0.0 }
 0x1f1   : > { %v893_v48 = vmax.f32 %v805_v38, 0.0 }
 0x1f2   : > { %v919_v7 = vpack.c.bf16 %v895_v8, %v894_v39  ;;  %v2370_v8 = vld [vmem:[%s3051_s3 + $0xb8] sm:$0xff]  }
 0x1f3   : > { %v918_v41 = vpack.c.bf16 %v893_v48, %v892_v40  ;;  %v2145_v42 = vpop.f32.mrb[32].mxu1  ;;  %2221 = vmatprep.subr.bf16.mxu1 %v2370_v8  ;;  %v2371_v40 = vld [vmem:[%s3051_s3 + $0xc0] sm:$0xff]   ;;  %v2373_v48 = vld [vmem:[%s3051_s3 + $0xd0] sm:$0xff]  }
 0x1f4   : > { %v826_v43 = vadd.f32 %v2145_v42, %v2788_v49  ;;  %v817_v44 = vpop.f32.mrb[33].mxu1  ;;  %2222 = vmatpush3.bf16.msra.mxu1 %v2370_v8  ;;  %2255 = vmatprep.subr.bf16.mxu0 %v2371_v40  ;;  %v2376_v42 = vld [vmem:[%s3051_s3 + $0xe8] sm:$0xff]  }
 0x1f5   : > { %v818_v45 = vadd.f32 %v817_v44, %v2788_v49  ;;  %v2146_v46 = vpop.f32.mrb[34].mxu1  ;;  %2187 = vmatprep.mubr.bf16.mxu0 %v918_v41  ;;  %2256 = vmatpush3.bf16.msra.mxu0 %v2371_v40  ;;  %v2375_v41 = vld [vmem:[%s3051_s3 + $0xe0] sm:$0xff]   ;;  %v947_v44 = vsub.s32 2, %v2532_v3 }
 0x1f6   : > { %v829_v50 = vadd.f32 %v2146_v46, %v2788_v49  ;;  %v820_v51 = vpop.f32.mrb[35].mxu1  ;;  %2188 = vmatmul.mubr.bf16.gmra.mrb[28].mxu0 %v919_v7  ;;  %v898_v53 = vmax.f32 %v826_v43, 0.0  ;;  %v2374_v7 = vld [vmem:[%s3051_s3 + $0xd8] sm:$0xff]   ;;  %v2377_v43 = vld [vmem:[%s3051_s3 + $0xf0] sm:$0xff]  }
 0x1f7   : > { %v821_v52 = vadd.f32 %v820_v51, %v2788_v49  ;;  %v896_v55 = vmax.f32 %v818_v45, 0.0  ;;  %v2848_v45 = vrot.slane %v2716_v47, %v947_v44 }
 0x1f8   : > { %v899_v54 = vmax.f32 %v829_v50, 0.0 }
 0x1f9   : > { %v897_v56 = vmax.f32 %v821_v52, 0.0 }
 0x1fa   : > { %v921_v57 = vpack.c.bf16 %v899_v54, %v898_v53 }
 0x1fb   : > { %v920_v58 = vpack.c.bf16 %v897_v56, %v896_v55  ;;  %v2149_v59 = vpop.f32.mrb[36].mxu1 }
 0x1fc   : > { %v842_v60 = vadd.f32 %v2149_v59, %v2788_v49  ;;  %v833_v61 = vpop.f32.mrb[37].mxu1 }
 0x1fd   : > { %v834_v62 = vadd.f32 %v833_v61, %v2788_v49  ;;  %v2150_v5 = vpop.f32.mrb[38].mxu1  ;;  %2191 = vmatprep.mubr.bf16.mxu0 %v920_v58 }
 0x1fe   : > { %v845_v6 = vadd.f32 %v2150_v5, %v2788_v49  ;;  %v836_v63 = vpop.f32.mrb[39].mxu1  ;;  %2192 = vmatmul.mubr.bf16.gmra.mrb[32].mxu0 %v921_v57  ;;  %v902_v1 = vmax.f32 %v842_v60, 0.0 }
 0x1ff   : > { %v837_v0 = vadd.f32 %v836_v63, %v2788_v49  ;;  %v900_v9 = vmax.f32 %v834_v62, 0.0 }
 0x200   : > { %v903_v2 = vmax.f32 %v845_v6, 0.0 }
 0x201   : > { %v901_v10 = vmax.f32 %v837_v0, 0.0 }
 0x202   : > { %v923_v11 = vpack.c.bf16 %v903_v2, %v902_v1 }
 0x203   : > { %v922_v12 = vpack.c.bf16 %v901_v10, %v900_v9  ;;  %v2153_v13 = vpop.f32.mrb[40].mxu1 }
 0x204   : > { %v858_v14 = vadd.f32 %v2153_v13, %v2788_v49  ;;  %v849_v15 = vpop.f32.mrb[41].mxu1 }
 0x205   : > { %v850_v16 = vadd.f32 %v849_v15, %v2788_v49  ;;  %v2154_v17 = vpop.f32.mrb[42].mxu1  ;;  %2195 = vmatprep.mubr.bf16.mxu0 %v922_v12 }
 0x206   : > { %v861_v18 = vadd.f32 %v2154_v17, %v2788_v49  ;;  %v852_v4 = vpop.f32.mrb[43].mxu1  ;;  %2196 = vmatmul.mubr.bf16.gmra.mrb[36].mxu0 %v923_v11  ;;  %v906_v20 = vmax.f32 %v858_v14, 0.0 }
 0x207   : > { %v853_v19 = vadd.f32 %v852_v4, %v2788_v49  ;;  %v904_v22 = vmax.f32 %v850_v16, 0.0 }
 0x208   : > { %v907_v21 = vmax.f32 %v861_v18, 0.0 }
 0x209   : > { %v905_v24 = vmax.f32 %v853_v19, 0.0 }
 0x20a   : > { %v925_v25 = vpack.c.bf16 %v907_v21, %v906_v20 }
 0x20b   : > { %v924_v26 = vpack.c.bf16 %v905_v24, %v904_v22  ;;  %v2157_v27 = vpop.f32.mrb[44].mxu1 }
 0x20c   : > { %v874_v23 = vadd.f32 %v2157_v27, %v2788_v49  ;;  %v865_v28 = vpop.f32.mrb[45].mxu1 }
 0x20d   : > { %v866_v29 = vadd.f32 %v865_v28, %v2788_v49  ;;  %v2158_v30 = vpop.f32.mrb[46].mxu1  ;;  %2199 = vmatprep.mubr.bf16.mxu0 %v924_v26 }
 0x20e   : > { %v877_v31 = vadd.f32 %v2158_v30, %v2788_v49  ;;  %v868_v32 = vpop.f32.mrb[47].mxu1  ;;  %2200 = vmatmul.mubr.bf16.gmra.mrb[40].mxu0 %v925_v25  ;;  %v910_v34 = vmax.f32 %v874_v23, 0.0 }
 0x20f   : > { %v869_v33 = vadd.f32 %v868_v32, %v2788_v49  ;;  %v908_v36 = vmax.f32 %v866_v29, 0.0  ;;  %v2372_v49 = vld [vmem:[%s3051_s3 + $0xc8] sm:$0xff]  }
 0x210   : > { %v911_v35 = vmax.f32 %v877_v31, 0.0  ;;  %2257 = vmatprep.subr.bf16.mxu0 %v2372_v49 }
 0x211   : > { %v909_v37 = vmax.f32 %v869_v33, 0.0  ;;  %2258 = vmatpush3.bf16.msra.mxu0 %v2372_v49 }
 0x212   : > { %v927_v38 = vpack.c.bf16 %v911_v35, %v910_v34  ;;  %2259 = vmatprep.subr.bf16.mxu0 %v2373_v48 }
 0x213   : > { %v926_v39 = vpack.c.bf16 %v909_v37, %v908_v36 }
 0x215   : > { %2203 = vmatprep.mubr.bf16.mxu0 %v926_v39  ;;  %2260 = vmatpush3.bf16.msra.mxu0 %v2373_v48 }
 0x216   : > { %2204 = vmatmul.mubr.bf16.gmra.mrb[44].mxu0 %v927_v38  ;;  %2261 = vmatprep.subr.bf16.mxu0 %v2374_v7 }
 0x219   : > { %2262 = vmatpush3.bf16.msra.mxu0 %v2374_v7 }
 0x21a   : > { %2263 = vmatprep.subr.bf16.mxu0 %v2375_v41 }
 0x21d   : > { %2264 = vmatpush3.bf16.msra.mxu0 %v2375_v41 }
 0x21e   : > { %2265 = vmatprep.subr.bf16.mxu0 %v2376_v42 }
 0x221   : > { %2266 = vmatpush3.bf16.msra.mxu0 %v2376_v42 }
 0x222   : > { %2267 = vmatprep.subr.bf16.mxu0 %v2377_v43 }
 0x225   : > { %2268 = vmatpush3.bf16.msra.mxu0 %v2377_v43 }
 0x2b1   : > { %v2177_v46 = vpop.f32.mrb[16].mxu0 }
 0x2b2   : > { %v1040_v50 = vadd.f32 %v2177_v46, %v2848_v45  ;;  %v1031_v51 = vpop.f32.mrb[17].mxu0 }
 0x2b3   : > { %v1032_v52 = vadd.f32 %v1031_v51, %v2848_v45  ;;  %v2178_v53 = vpop.f32.mrb[18].mxu0 }
 0x2b4   : > { %v1043_v54 = vadd.f32 %v2178_v53, %v2848_v45  ;;  %v1034_v55 = vpop.f32.mrb[19].mxu0  ;;  %v1160_v57 = vmax.f32 %v1040_v50, 0.0 }
 0x2b5   : > { %v1035_v56 = vadd.f32 %v1034_v55, %v2848_v45  ;;  %v1158_v59 = vmax.f32 %v1032_v52, 0.0 }
 0x2b6   : > { %v1161_v58 = vmax.f32 %v1043_v54, 0.0 }
 0x2b7   : > { %v1159_v60 = vmax.f32 %v1035_v56, 0.0 }
 0x2b8   : > { %v1191_v61 = vpack.c.bf16 %v1161_v58, %v1160_v57 }
 0x2b9   : > { %v1190_v62 = vpack.c.bf16 %v1159_v60, %v1158_v59  ;;  %v2181_v5 = vpop.f32.mrb[20].mxu0 }
 0x2ba   : > { %v1056_v6 = vadd.f32 %v2181_v5, %v2848_v45  ;;  %v1047_v63 = vpop.f32.mrb[21].mxu0 }
 0x2bb   : > { %v1048_v0 = vadd.f32 %v1047_v63, %v2848_v45  ;;  %v2182_v1 = vpop.f32.mrb[22].mxu0  ;;  %2223 = vmatprep.mubr.bf16.mxu1 %v1190_v62 }
 0x2bc   : > { %v1059_v2 = vadd.f32 %v2182_v1, %v2848_v45  ;;  %v1050_v9 = vpop.f32.mrb[23].mxu0  ;;  %2224 = vmatmul.mubr.bf16.vlgmr.msra.gmra.mrb[48].mxu1 %v1191_v61  ;;  %v1164_v11 = vmax.f32 %v1056_v6, 0.0 }
 0x2bd   : > { %v1051_v10 = vadd.f32 %v1050_v9, %v2848_v45  ;;  %v1162_v13 = vmax.f32 %v1048_v0, 0.0 }
 0x2be   : > { %v1165_v12 = vmax.f32 %v1059_v2, 0.0 }
 0x2bf   : > { %v1163_v14 = vmax.f32 %v1051_v10, 0.0 }
 0x2c0   : > { %v1193_v15 = vpack.c.bf16 %v1165_v12, %v1164_v11 }
 0x2c1   : > { %v1192_v16 = vpack.c.bf16 %v1163_v14, %v1162_v13  ;;  %v2185_v17 = vpop.f32.mrb[24].mxu0 }
 0x2c2   : > { %v1072_v18 = vadd.f32 %v2185_v17, %v2848_v45  ;;  %v1063_v4 = vpop.f32.mrb[25].mxu0 }
 0x2c3   : > { %v1064_v19 = vadd.f32 %v1063_v4, %v2848_v45  ;;  %v2186_v20 = vpop.f32.mrb[26].mxu0  ;;  %2227 = vmatprep.mubr.bf16.mxu1 %v1192_v16 }
 0x2c4   : > { %v1075_v21 = vadd.f32 %v2186_v20, %v2848_v45  ;;  %v1066_v22 = vpop.f32.mrb[27].mxu0  ;;  %2228 = vmatmul.mubr.bf16.gmra.mrb[52].mxu1 %v1193_v15  ;;  %v1168_v25 = vmax.f32 %v1072_v18, 0.0 }
 0x2c5   : > { %v1067_v24 = vadd.f32 %v1066_v22, %v2848_v45  ;;  %v1166_v27 = vmax.f32 %v1064_v19, 0.0 }
 0x2c6   : > { %v1169_v26 = vmax.f32 %v1075_v21, 0.0 }
 0x2c7   : > { %v1167_v23 = vmax.f32 %v1067_v24, 0.0 }
 0x2c8   : > { %v1195_v28 = vpack.c.bf16 %v1169_v26, %v1168_v25 }
 0x2c9   : > { %v1194_v29 = vpack.c.bf16 %v1167_v23, %v1166_v27  ;;  %v2189_v30 = vpop.f32.mrb[28].mxu0 }
 0x2ca   : > { %v1088_v31 = vadd.f32 %v2189_v30, %v2848_v45  ;;  %v1079_v32 = vpop.f32.mrb[29].mxu0 }
 0x2cb   : > { %v1080_v33 = vadd.f32 %v1079_v32, %v2848_v45  ;;  %v2190_v34 = vpop.f32.mrb[30].mxu0  ;;  %2231 = vmatprep.mubr.bf16.mxu1 %v1194_v29 }
 0x2cc   : > { %v1091_v35 = vadd.f32 %v2190_v34, %v2848_v45  ;;  %v1082_v36 = vpop.f32.mrb[31].mxu0  ;;  %2232 = vmatmul.mubr.bf16.gmra.mrb[56].mxu1 %v1195_v28  ;;  %v1172_v38 = vmax.f32 %v1088_v31, 0.0 }
 0x2cd   : > { %v1083_v37 = vadd.f32 %v1082_v36, %v2848_v45  ;;  %v1170_v8 = vmax.f32 %v1080_v33, 0.0 }
 0x2ce   : > { %v1173_v39 = vmax.f32 %v1091_v35, 0.0 }
 0x2cf   : > { %v1171_v40 = vmax.f32 %v1083_v37, 0.0 }
 0x2d0   : > { %v1197_v49 = vpack.c.bf16 %v1173_v39, %v1172_v38  ;;  %v2378_v39 = vld [vmem:[%s3051_s3 + $0xf8] sm:$0xff]  }
 0x2d1   : > { %v1196_v48 = vpack.c.bf16 %v1171_v40, %v1170_v8  ;;  %v2193_v7 = vpop.f32.mrb[32].mxu0  ;;  %2269 = vmatprep.subr.bf16.mxu0 %v2378_v39  ;;  %v1225_v8 = vsub.s32 3, %v2532_v3 }
 0x2d2   : > { %v1104_v41 = vadd.f32 %v2193_v7, %v2848_v45  ;;  %v1095_v42 = vpop.f32.mrb[33].mxu0  ;;  %2270 = vmatpush3.bf16.msra.mxu0 %v2378_v39 }
 0x2d3   : > { %v1096_v43 = vadd.f32 %v1095_v42, %v2848_v45  ;;  %v2194_v44 = vpop.f32.mrb[34].mxu0  ;;  %2235 = vmatprep.mubr.bf16.mxu1 %v1196_v48  ;;  %v2887_v40 = vrot.slane %v2716_v47, %v1225_v8 }
 0x2d4   : > { %v1107_v46 = vadd.f32 %v2194_v44, %v2848_v45  ;;  %v1098_v50 = vpop.f32.mrb[35].mxu0  ;;  %2236 = vmatmul.mubr.bf16.gmra.mrb[60].mxu1 %v1197_v49  ;;  %v1176_v52 = vmax.f32 %v1104_v41, 0.0 }
 0x2d5   : > { %v1099_v51 = vadd.f32 %v1098_v50, %v2848_v45  ;;  %v1174_v54 = vmax.f32 %v1096_v43, 0.0 }
 0x2d6   : > { %v1177_v53 = vmax.f32 %v1107_v46, 0.0 }
 0x2d7   : > { %v1175_v55 = vmax.f32 %v1099_v51, 0.0 }
 0x2d8   : > { %v1199_v56 = vpack.c.bf16 %v1177_v53, %v1176_v52 }
 0x2d9   : > { %v1198_v57 = vpack.c.bf16 %v1175_v55, %v1174_v54  ;;  %v2197_v58 = vpop.f32.mrb[36].mxu0 }
 0x2da   : > { %v1120_v59 = vadd.f32 %v2197_v58, %v2848_v45  ;;  %v1111_v60 = vpop.f32.mrb[37].mxu0 }
 0x2db   : > { %v1112_v61 = vadd.f32 %v1111_v60, %v2848_v45  ;;  %v2198_v62 = vpop.f32.mrb[38].mxu0  ;;  %2239 = vmatprep.mubr.bf16.mxu1 %v1198_v57 }
 0x2dc   : > { %v1123_v5 = vadd.f32 %v2198_v62, %v2848_v45  ;;  %v1114_v6 = vpop.f32.mrb[39].mxu0  ;;  %2240 = vmatmul.mubr.bf16.gmra.mrb[64].mxu1 %v1199_v56  ;;  %v1180_v0 = vmax.f32 %v1120_v59, 0.0 }
 0x2dd   : > { %v1115_v63 = vadd.f32 %v1114_v6, %v2848_v45  ;;  %v1178_v2 = vmax.f32 %v1112_v61, 0.0 }
 0x2de   : > { %v1181_v1 = vmax.f32 %v1123_v5, 0.0 }
 0x2df   : > { %v1179_v9 = vmax.f32 %v1115_v63, 0.0 }
 0x2e0   : > { %v1201_v10 = vpack.c.bf16 %v1181_v1, %v1180_v0 }
 0x2e1   : > { %v1200_v11 = vpack.c.bf16 %v1179_v9, %v1178_v2  ;;  %v2201_v12 = vpop.f32.mrb[40].mxu0 }
 0x2e2   : > { %v1136_v13 = vadd.f32 %v2201_v12, %v2848_v45  ;;  %v1127_v14 = vpop.f32.mrb[41].mxu0 }
 0x2e3   : > { %v1128_v15 = vadd.f32 %v1127_v14, %v2848_v45  ;;  %v2202_v16 = vpop.f32.mrb[42].mxu0  ;;  %2243 = vmatprep.mubr.bf16.mxu1 %v1200_v11 }
 0x2e4   : > { %v1139_v17 = vadd.f32 %v2202_v16, %v2848_v45  ;;  %v1130_v18 = vpop.f32.mrb[43].mxu0  ;;  %2244 = vmatmul.mubr.bf16.gmra.mrb[68].mxu1 %v1201_v10  ;;  %v1184_v19 = vmax.f32 %v1136_v13, 0.0 }
 0x2e5   : > { %v1131_v4 = vadd.f32 %v1130_v18, %v2848_v45  ;;  %v1182_v21 = vmax.f32 %v1128_v15, 0.0 }
 0x2e6   : > { %v1185_v20 = vmax.f32 %v1139_v17, 0.0 }
 0x2e7   : > { %v1183_v22 = vmax.f32 %v1131_v4, 0.0 }
 0x2e8   : > { %v1203_v24 = vpack.c.bf16 %v1185_v20, %v1184_v19 }
 0x2e9   : > { %v1202_v25 = vpack.c.bf16 %v1183_v22, %v1182_v21  ;;  %v2205_v26 = vpop.f32.mrb[44].mxu0 }
 0x2ea   : > { %v1152_v27 = vadd.f32 %v2205_v26, %v2848_v45  ;;  %v1143_v23 = vpop.f32.mrb[45].mxu0 }
 0x2eb   : > { %v1144_v28 = vadd.f32 %v1143_v23, %v2848_v45  ;;  %v2206_v29 = vpop.f32.mrb[46].mxu0  ;;  %2247 = vmatprep.mubr.bf16.mxu1 %v1202_v25 }
 0x2ec   : > { %v1155_v30 = vadd.f32 %v2206_v29, %v2848_v45  ;;  %v1146_v31 = vpop.f32.mrb[47].mxu0  ;;  %2248 = vmatmul.mubr.bf16.gmra.mrb[72].mxu1 %v1203_v24  ;;  %v1188_v33 = vmax.f32 %v1152_v27, 0.0 }
 0x2ed   : > { %v1147_v32 = vadd.f32 %v1146_v31, %v2848_v45  ;;  %v1186_v35 = vmax.f32 %v1144_v28, 0.0 }
 0x2ee   : > { %v1189_v34 = vmax.f32 %v1155_v30, 0.0 }
 0x2ef   : > { %v1187_v36 = vmax.f32 %v1147_v32, 0.0 }
 0x2f0   : > { %v1205_v37 = vpack.c.bf16 %v1189_v34, %v1188_v33 }
 0x2f1   : > { %v1204_v38 = vpack.c.bf16 %v1187_v36, %v1186_v35 }
 0x2f3   : > { %2251 = vmatprep.mubr.bf16.mxu1 %v1204_v38 }
 0x2f4   : > { %2252 = vmatmul.mubr.bf16.gmra.mrb[76].mxu1 %v1205_v37 }
 0x38f   : > { %v2225_v45 = vpop.f32.mrb[48].mxu1 }
 0x390   : > { %v1318_v49 = vadd.f32 %v2225_v45, %v2887_v40  ;;  %v1309_v48 = vpop.f32.mrb[49].mxu1 }
 0x391   : > { %v1310_v7 = vadd.f32 %v1309_v48, %v2887_v40  ;;  %v2226_v41 = vpop.f32.mrb[50].mxu1 }
 0x392   : > { %v1321_v42 = vadd.f32 %v2226_v41, %v2887_v40  ;;  %v1312_v43 = vpop.f32.mrb[51].mxu1  ;;  %v1438_v46 = vmax.f32 %v1318_v49, 0.0 }
 0x393   : > { %v1313_v44 = vadd.f32 %v1312_v43, %v2887_v40  ;;  %v1436_v51 = vmax.f32 %v1310_v7, 0.0 }
 0x394   : > { %v1439_v50 = vmax.f32 %v1321_v42, 0.0 }
 0x395   : > { %v1437_v52 = vmax.f32 %v1313_v44, 0.0 }
 0x396   : > { %v1469_v53 = vpack.c.bf16 %v1439_v50, %v1438_v46 }
 0x397   : > { %v1468_v54 = vpack.c.bf16 %v1437_v52, %v1436_v51  ;;  %v2229_v47 = vpop.f32.mrb[52].mxu1 }
 0x398   : > { %v1334_v55 = vadd.f32 %v2229_v47, %v2887_v40  ;;  %v1325_v56 = vpop.f32.mrb[53].mxu1 }
 0x399   : > { %v1326_v57 = vadd.f32 %v1325_v56, %v2887_v40  ;;  %v2230_v58 = vpop.f32.mrb[54].mxu1  ;;  %2271 = vmatprep.mubr.bf16.mxu0 %v1468_v54 }
 0x39a   : > { %v1337_v59 = vadd.f32 %v2230_v58, %v2887_v40  ;;  %v1328_v60 = vpop.f32.mrb[55].mxu1  ;;  %2272 = vmatmul.mubr.bf16.vlgmr.msra.gmra.mrb[48].mxu0 %v1469_v53  ;;  %v1442_v62 = vmax.f32 %v1334_v55, 0.0 }
 0x39b   : > { %v1329_v61 = vadd.f32 %v1328_v60, %v2887_v40  ;;  %v1440_v6 = vmax.f32 %v1326_v57, 0.0 }
 0x39c   : > { %v1443_v5 = vmax.f32 %v1337_v59, 0.0 }
 0x39d   : > { %v1441_v63 = vmax.f32 %v1329_v61, 0.0 }
 0x39e   : > { %v1471_v0 = vpack.c.bf16 %v1443_v5, %v1442_v62 }
 0x39f   : > { %v1470_v1 = vpack.c.bf16 %v1441_v63, %v1440_v6  ;;  %v2233_v2 = vpop.f32.mrb[56].mxu1 }
 0x3a0   : > { %v1350_v9 = vadd.f32 %v2233_v2, %v2887_v40  ;;  %v1341_v10 = vpop.f32.mrb[57].mxu1 }
 0x3a1   : > { %v1342_v11 = vadd.f32 %v1341_v10, %v2887_v40  ;;  %v2234_v12 = vpop.f32.mrb[58].mxu1  ;;  %2275 = vmatprep.mubr.bf16.mxu0 %v1470_v1 }
 0x3a2   : > { %v1353_v13 = vadd.f32 %v2234_v12, %v2887_v40  ;;  %v1344_v14 = vpop.f32.mrb[59].mxu1  ;;  %2276 = vmatmul.mubr.bf16.gmra.mrb[52].mxu0 %v1471_v0  ;;  %v1446_v16 = vmax.f32 %v1350_v9, 0.0 }
 0x3a3   : > { %v1345_v15 = vadd.f32 %v1344_v14, %v2887_v40  ;;  %v1444_v18 = vmax.f32 %v1342_v11, 0.0 }
 0x3a4   : > { %v1447_v17 = vmax.f32 %v1353_v13, 0.0 }
 0x3a5   : > { %v1445_v4 = vmax.f32 %v1345_v15, 0.0 }
 0x3a6   : > { %v1473_v19 = vpack.c.bf16 %v1447_v17, %v1446_v16 }
 0x3a7   : > { %v1472_v20 = vpack.c.bf16 %v1445_v4, %v1444_v18  ;;  %v2237_v21 = vpop.f32.mrb[60].mxu1 }
 0x3a8   : > { %v1366_v22 = vadd.f32 %v2237_v21, %v2887_v40  ;;  %v1357_v24 = vpop.f32.mrb[61].mxu1 }
 0x3a9   : > { %v1358_v25 = vadd.f32 %v1357_v24, %v2887_v40  ;;  %v2238_v26 = vpop.f32.mrb[62].mxu1  ;;  %2279 = vmatprep.mubr.bf16.mxu0 %v1472_v20 }
 0x3aa   : > { %v1369_v27 = vadd.f32 %v2238_v26, %v2887_v40  ;;  %v1360_v23 = vpop.f32.mrb[63].mxu1  ;;  %2280 = vmatmul.mubr.bf16.gmra.mrb[56].mxu0 %v1473_v19  ;;  %v1450_v29 = vmax.f32 %v1366_v22, 0.0 }
 0x3ab   : > { %v1361_v28 = vadd.f32 %v1360_v23, %v2887_v40  ;;  %v1448_v31 = vmax.f32 %v1358_v25, 0.0 }
 0x3ac   : > { %v1451_v30 = vmax.f32 %v1369_v27, 0.0 }
 0x3ad   : > { %v1449_v32 = vmax.f32 %v1361_v28, 0.0 }
 0x3ae   : > { %v1475_v33 = vpack.c.bf16 %v1451_v30, %v1450_v29  ;;  %v1503_v29 = vsub.s32 4, %v2532_v3  ;;  %v2379_v30 = vld [vmem:[%s3052_s4] sm:$0xff] }
 0x3af   : > { %v1474_v34 = vpack.c.bf16 %v1449_v32, %v1448_v31  ;;  %v2241_v35 = vpop.f32.mrb[64].mxu1 }
 0x3b0   : > { %v1382_v36 = vadd.f32 %v2241_v35, %v2887_v40  ;;  %v1373_v37 = vpop.f32.mrb[65].mxu1  ;;  %v2926_v31 = vrot.slane %v2379_v30, %v1503_v29 }
 0x3b1   : > { %v1374_v38 = vadd.f32 %v1373_v37, %v2887_v40  ;;  %v2242_v39 = vpop.f32.mrb[66].mxu1  ;;  %2283 = vmatprep.mubr.bf16.mxu0 %v1474_v34 }
 0x3b2   : > { %v1385_v8 = vadd.f32 %v2242_v39, %v2887_v40  ;;  %v1376_v45 = vpop.f32.mrb[67].mxu1  ;;  %2284 = vmatmul.mubr.bf16.gmra.mrb[60].mxu0 %v1475_v33  ;;  %v1454_v48 = vmax.f32 %v1382_v36, 0.0 }
 0x3b3   : > { %v1377_v49 = vadd.f32 %v1376_v45, %v2887_v40  ;;  %v1452_v41 = vmax.f32 %v1374_v38, 0.0 }
 0x3b4   : > { %v1455_v7 = vmax.f32 %v1385_v8, 0.0 }
 0x3b5   : > { %v1453_v42 = vmax.f32 %v1377_v49, 0.0 }
 0x3b6   : > { %v1477_v43 = vpack.c.bf16 %v1455_v7, %v1454_v48 }
 0x3b7   : > { %v1476_v44 = vpack.c.bf16 %v1453_v42, %v1452_v41  ;;  %v2245_v46 = vpop.f32.mrb[68].mxu1 }
 0x3b8   : > { %v1398_v50 = vadd.f32 %v2245_v46, %v2887_v40  ;;  %v1389_v51 = vpop.f32.mrb[69].mxu1 }
 0x3b9   : > { %v1390_v52 = vadd.f32 %v1389_v51, %v2887_v40  ;;  %v2246_v53 = vpop.f32.mrb[70].mxu1  ;;  %2287 = vmatprep.mubr.bf16.mxu0 %v1476_v44 }
 0x3ba   : > { %v1401_v54 = vadd.f32 %v2246_v53, %v2887_v40  ;;  %v1392_v47 = vpop.f32.mrb[71].mxu1  ;;  %2288 = vmatmul.mubr.bf16.gmra.mrb[64].mxu0 %v1477_v43  ;;  %v1458_v56 = vmax.f32 %v1398_v50, 0.0 }
 0x3bb   : > { %v1393_v55 = vadd.f32 %v1392_v47, %v2887_v40  ;;  %v1456_v58 = vmax.f32 %v1390_v52, 0.0 }
 0x3bc   : > { %v1459_v57 = vmax.f32 %v1401_v54, 0.0 }
 0x3bd   : > { %v1457_v59 = vmax.f32 %v1393_v55, 0.0 }
 0x3be   : > { %v1479_v60 = vpack.c.bf16 %v1459_v57, %v1458_v56 }
 0x3bf   : > { %v1478_v61 = vpack.c.bf16 %v1457_v59, %v1456_v58  ;;  %v2249_v62 = vpop.f32.mrb[72].mxu1 }
 0x3c0   : > { %v1414_v5 = vadd.f32 %v2249_v62, %v2887_v40  ;;  %v1405_v6 = vpop.f32.mrb[73].mxu1 }
 0x3c1   : > { %v1406_v63 = vadd.f32 %v1405_v6, %v2887_v40  ;;  %v2250_v0 = vpop.f32.mrb[74].mxu1  ;;  %2291 = vmatprep.mubr.bf16.mxu0 %v1478_v61 }
 0x3c2   : > { %v1417_v1 = vadd.f32 %v2250_v0, %v2887_v40  ;;  %v1408_v2 = vpop.f32.mrb[75].mxu1  ;;  %2292 = vmatmul.mubr.bf16.gmra.mrb[68].mxu0 %v1479_v60  ;;  %v1462_v10 = vmax.f32 %v1414_v5, 0.0 }
 0x3c3   : > { %v1409_v9 = vadd.f32 %v1408_v2, %v2887_v40  ;;  %v1460_v12 = vmax.f32 %v1406_v63, 0.0 }
 0x3c4   : > { %v1463_v11 = vmax.f32 %v1417_v1, 0.0 }
 0x3c5   : > { %v1461_v13 = vmax.f32 %v1409_v9, 0.0 }
 0x3c6   : > { %v1481_v14 = vpack.c.bf16 %v1463_v11, %v1462_v10 }
 0x3c7   : > { %v1480_v15 = vpack.c.bf16 %v1461_v13, %v1460_v12  ;;  %v2253_v16 = vpop.f32.mrb[76].mxu1 }
 0x3c8   : > { %v1430_v17 = vadd.f32 %v2253_v16, %v2887_v40  ;;  %v1421_v18 = vpop.f32.mrb[77].mxu1 }
 0x3c9   : > { %v1422_v4 = vadd.f32 %v1421_v18, %v2887_v40  ;;  %v2254_v19 = vpop.f32.mrb[78].mxu1  ;;  %2295 = vmatprep.mubr.bf16.mxu0 %v1480_v15 }
 0x3ca   : > { %v1433_v20 = vadd.f32 %v2254_v19, %v2887_v40  ;;  %v1424_v21 = vpop.f32.mrb[79].mxu1  ;;  %2296 = vmatmul.mubr.bf16.gmra.mrb[72].mxu0 %v1481_v14  ;;  %v1466_v24 = vmax.f32 %v1430_v17, 0.0 }
 0x3cb   : > { %v1425_v22 = vadd.f32 %v1424_v21, %v2887_v40  ;;  %v1464_v26 = vmax.f32 %v1422_v4, 0.0 }
 0x3cc   : > { %v1467_v25 = vmax.f32 %v1433_v20, 0.0 }
 0x3cd   : > { %v1465_v27 = vmax.f32 %v1425_v22, 0.0 }
 0x3ce   : > { %v1483_v23 = vpack.c.bf16 %v1467_v25, %v1466_v24 }
 0x3cf   : > { %v1482_v28 = vpack.c.bf16 %v1465_v27, %v1464_v26 }
 0x3d1   : > { %2299 = vmatprep.mubr.bf16.mxu0 %v1482_v28 }
 0x3d2   : > { %2300 = vmatmul.mubr.bf16.gmra.mrb[76].mxu0 %v1483_v23 }
 0x46d   : > { %v2273_v40 = vpop.f32.mrb[48].mxu0 }
 0x46e   : > { %v1596_v32 = vadd.f32 %v2273_v40, %v2926_v31  ;;  %v1587_v33 = vpop.f32.mrb[49].mxu0 }
 0x46f   : > { %v1588_v34 = vadd.f32 %v1587_v33, %v2926_v31  ;;  %v2274_v35 = vpop.f32.mrb[50].mxu0 }
 0x470   : > { %v1716_v36 = vmax.f32 %v1596_v32, 0.0  ;;  %v1599_v37 = vadd.f32 %v2274_v35, %v2926_v31  ;;  %v1590_v3 = vpop.f32.mrb[51].mxu0 }
 0x471   : > { %v1714_v38 = vmax.f32 %v1588_v34, 0.0  ;;  %v1591_v39 = vadd.f32 %v1590_v3, %v2926_v31 }
 0x472   : > { %1748 = vst [vmem:[%s2934_s26 + $0x10] sm:$0xff] %v1716_v36  ;;  %v1717_v8 = vmax.f32 %v1599_v37, 0.0 }
 0x473   : > { %1746 = vst [vmem:[%s2934_s26] sm:$0xff] %v1714_v38  ;;  %v1715_v45 = vmax.f32 %v1591_v39, 0.0 }
 0x474   : > { %1749 = vst [vmem:[%s2934_s26 + $0x18] sm:$0xff] %v1717_v8 }
 0x475   : > { %1747 = vst [vmem:[%s2934_s26 + $0x8] sm:$0xff] %v1715_v45  ;;  %v2277_v49 = vpop.f32.mrb[52].mxu0 }
 0x476   : > { %v1612_v48 = vadd.f32 %v2277_v49, %v2926_v31  ;;  %v1603_v7 = vpop.f32.mrb[53].mxu0 }
 0x477   : > { %v1604_v41 = vadd.f32 %v1603_v7, %v2926_v31  ;;  %v2278_v42 = vpop.f32.mrb[54].mxu0 }
 0x478   : > { %v1720_v43 = vmax.f32 %v1612_v48, 0.0  ;;  %v1615_v44 = vadd.f32 %v2278_v42, %v2926_v31  ;;  %v1606_v46 = vpop.f32.mrb[55].mxu0 }
 0x479   : > { %v1718_v50 = vmax.f32 %v1604_v41, 0.0  ;;  %v1607_v51 = vadd.f32 %v1606_v46, %v2926_v31 }
 0x47a   : > { %1752 = vst [vmem:[%s2934_s26 + $0x30] sm:$0xff] %v1720_v43  ;;  %v1721_v52 = vmax.f32 %v1615_v44, 0.0 }
 0x47b   : > { %1750 = vst [vmem:[%s2934_s26 + $0x20] sm:$0xff] %v1718_v50  ;;  %v1719_v53 = vmax.f32 %v1607_v51, 0.0 }
 0x47c   : > { %1753 = vst [vmem:[%s2934_s26 + $0x38] sm:$0xff] %v1721_v52 }
 0x47d   : > { %1751 = vst [vmem:[%s2934_s26 + $0x28] sm:$0xff] %v1719_v53  ;;  %v2281_v54 = vpop.f32.mrb[56].mxu0 }
 0x47e   : > { %v1628_v47 = vadd.f32 %v2281_v54, %v2926_v31  ;;  %v1619_v55 = vpop.f32.mrb[57].mxu0 }
 0x47f   : > { %v1620_v56 = vadd.f32 %v1619_v55, %v2926_v31  ;;  %v2282_v57 = vpop.f32.mrb[58].mxu0 }
 0x480   : > { %v1724_v58 = vmax.f32 %v1628_v47, 0.0  ;;  %v1631_v59 = vadd.f32 %v2282_v57, %v2926_v31  ;;  %v1622_v60 = vpop.f32.mrb[59].mxu0 }
 0x481   : > { %v1722_v61 = vmax.f32 %v1620_v56, 0.0  ;;  %v1623_v62 = vadd.f32 %v1622_v60, %v2926_v31 }
 0x482   : > { %1756 = vst [vmem:[%s2934_s26 + $0x50] sm:$0xff] %v1724_v58  ;;  %v1725_v5 = vmax.f32 %v1631_v59, 0.0 }
 0x483   : > { %1754 = vst [vmem:[%s2934_s26 + $0x40] sm:$0xff] %v1722_v61  ;;  %v1723_v6 = vmax.f32 %v1623_v62, 0.0 }
 0x484   : > { %1757 = vst [vmem:[%s2934_s26 + $0x58] sm:$0xff] %v1725_v5 }
 0x485   : > { %1755 = vst [vmem:[%s2934_s26 + $0x48] sm:$0xff] %v1723_v6  ;;  %v2285_v63 = vpop.f32.mrb[60].mxu0 }
 0x486   : > { %v1644_v0 = vadd.f32 %v2285_v63, %v2926_v31  ;;  %v1635_v1 = vpop.f32.mrb[61].mxu0 }
 0x487   : > { %v1636_v2 = vadd.f32 %v1635_v1, %v2926_v31  ;;  %v2286_v9 = vpop.f32.mrb[62].mxu0 }
 0x488   : > { %v1728_v10 = vmax.f32 %v1644_v0, 0.0  ;;  %v1647_v11 = vadd.f32 %v2286_v9, %v2926_v31  ;;  %v1638_v12 = vpop.f32.mrb[63].mxu0 }
 0x489   : > { %v1726_v13 = vmax.f32 %v1636_v2, 0.0  ;;  %v1639_v14 = vadd.f32 %v1638_v12, %v2926_v31 }
 0x48a   : > { %1760 = vst [vmem:[%s2934_s26 + $0x70] sm:$0xff] %v1728_v10  ;;  %v1729_v15 = vmax.f32 %v1647_v11, 0.0 }
 0x48b   : > { %1758 = vst [vmem:[%s2934_s26 + $0x60] sm:$0xff] %v1726_v13  ;;  %v1727_v16 = vmax.f32 %v1639_v14, 0.0 }
 0x48c   : > { %1761 = vst [vmem:[%s2934_s26 + $0x78] sm:$0xff] %v1729_v15 }
 0x48d   : > { %1759 = vst [vmem:[%s2934_s26 + $0x68] sm:$0xff] %v1727_v16  ;;  %v2289_v17 = vpop.f32.mrb[64].mxu0 }
 0x48e   : > { %v1660_v18 = vadd.f32 %v2289_v17, %v2926_v31  ;;  %v1651_v4 = vpop.f32.mrb[65].mxu0 }
 0x48f   : > { %v1652_v19 = vadd.f32 %v1651_v4, %v2926_v31  ;;  %v2290_v20 = vpop.f32.mrb[66].mxu0 }
 0x490   : > { %v1732_v21 = vmax.f32 %v1660_v18, 0.0  ;;  %v1663_v22 = vadd.f32 %v2290_v20, %v2926_v31  ;;  %v1654_v24 = vpop.f32.mrb[67].mxu0 }
 0x491   : > { %v1730_v25 = vmax.f32 %v1652_v19, 0.0  ;;  %v1655_v26 = vadd.f32 %v1654_v24, %v2926_v31 }
 0x492   : > { %1764 = vst [vmem:[%s2934_s26 + $0x90] sm:$0xff] %v1732_v21  ;;  %v1733_v27 = vmax.f32 %v1663_v22, 0.0 }
 0x493   : > { %1762 = vst [vmem:[%s2934_s26 + $0x80] sm:$0xff] %v1730_v25  ;;  %v1731_v23 = vmax.f32 %v1655_v26, 0.0 }
 0x494   : > { %1765 = vst [vmem:[%s2934_s26 + $0x98] sm:$0xff] %v1733_v27 }
 0x495   : > { %1763 = vst [vmem:[%s2934_s26 + $0x88] sm:$0xff] %v1731_v23  ;;  %v2293_v28 = vpop.f32.mrb[68].mxu0 }
 0x496   : > { %v1676_v29 = vadd.f32 %v2293_v28, %v2926_v31  ;;  %v1667_v30 = vpop.f32.mrb[69].mxu0 }
 0x497   : > { %v1668_v40 = vadd.f32 %v1667_v30, %v2926_v31  ;;  %v2294_v32 = vpop.f32.mrb[70].mxu0 }
 0x498   : > { %v1736_v33 = vmax.f32 %v1676_v29, 0.0  ;;  %v1679_v34 = vadd.f32 %v2294_v32, %v2926_v31  ;;  %v1670_v35 = vpop.f32.mrb[71].mxu0 }
 0x499   : > { %v1734_v36 = vmax.f32 %v1668_v40, 0.0  ;;  %v1671_v37 = vadd.f32 %v1670_v35, %v2926_v31 }
 0x49a   : > { %1768 = vst [vmem:[%s2934_s26 + $0xb0] sm:$0xff] %v1736_v33  ;;  %v1737_v3 = vmax.f32 %v1679_v34, 0.0 }
 0x49b   : > { %1766 = vst [vmem:[%s2934_s26 + $0xa0] sm:$0xff] %v1734_v36  ;;  %v1735_v38 = vmax.f32 %v1671_v37, 0.0 }
 0x49c   : > { %1769 = vst [vmem:[%s2934_s26 + $0xb8] sm:$0xff] %v1737_v3 }
 0x49d   : > { %1767 = vst [vmem:[%s2934_s26 + $0xa8] sm:$0xff] %v1735_v38  ;;  %v2297_v39 = vpop.f32.mrb[72].mxu0 }
 0x49e   : > { %v1692_v8 = vadd.f32 %v2297_v39, %v2926_v31  ;;  %v1683_v45 = vpop.f32.mrb[73].mxu0 }
 0x49f   : > { %v1684_v49 = vadd.f32 %v1683_v45, %v2926_v31  ;;  %v2298_v48 = vpop.f32.mrb[74].mxu0 }
 0x4a0   : > { %v1740_v7 = vmax.f32 %v1692_v8, 0.0  ;;  %v1695_v41 = vadd.f32 %v2298_v48, %v2926_v31  ;;  %v1686_v42 = vpop.f32.mrb[75].mxu0 }
 0x4a1   : > { %v1738_v43 = vmax.f32 %v1684_v49, 0.0  ;;  %v1687_v44 = vadd.f32 %v1686_v42, %v2926_v31 }
 0x4a2   : > { %1772 = vst [vmem:[%s2934_s26 + $0xd0] sm:$0xff] %v1740_v7  ;;  %v1741_v46 = vmax.f32 %v1695_v41, 0.0 }
 0x4a3   : > { %1770 = vst [vmem:[%s2934_s26 + $0xc0] sm:$0xff] %v1738_v43  ;;  %v1739_v50 = vmax.f32 %v1687_v44, 0.0 }
 0x4a4   : > { %1773 = vst [vmem:[%s2934_s26 + $0xd8] sm:$0xff] %v1741_v46 }
 0x4a5   : > { %1771 = vst [vmem:[%s2934_s26 + $0xc8] sm:$0xff] %v1739_v50  ;;  %v2301_v51 = vpop.f32.mrb[76].mxu0 }
 0x4a6   : > { %v1708_v52 = vadd.f32 %v2301_v51, %v2926_v31  ;;  %v1699_v53 = vpop.f32.mrb[77].mxu0 }
 0x4a7   : > { %v1700_v54 = vadd.f32 %v1699_v53, %v2926_v31  ;;  %v2302_v47 = vpop.f32.mrb[78].mxu0 }
 0x4a8   : > { %v1744_v55 = vmax.f32 %v1708_v52, 0.0  ;;  %v1711_v56 = vadd.f32 %v2302_v47, %v2926_v31  ;;  %v1702_v57 = vpop.f32.mrb[79].mxu0 }
 0x4a9   : > { %v1742_v58 = vmax.f32 %v1700_v54, 0.0  ;;  %v1703_v59 = vadd.f32 %v1702_v57, %v2926_v31 }
 0x4aa   : > { %1776 = vst [vmem:[%s2934_s26 + $0xf0] sm:$0xff] %v1744_v55  ;;  %v1745_v60 = vmax.f32 %v1711_v56, 0.0 }
 0x4ab   : > { %1774 = vst [vmem:[%s2934_s26 + $0xe0] sm:$0xff] %v1742_v58  ;;  %v1743_v61 = vmax.f32 %v1703_v59, 0.0 }
 0x4ac   : > { %1777 = vst [vmem:[%s2934_s26 + $0xf8] sm:$0xff] %v1745_v60 }
 0x4ad   : > { %1775 = vst [vmem:[%s2934_s26 + $0xe8] sm:$0xff] %v1743_v61 }
 0x4ae   : > { %2393 = shalt.err (!%p2390_p3)
}
 0x4af   : > { %s2394_s14 = scalar_lea.hbm %s2998_s9, 4096  ;;  %s2398_s17 = scalar_lea.hbm %s3053_s5, 16384 }
 0x4b0   : > { %p2395_p4 = scmp.ne.s32.totalorder %s2998_s9, %s2394_s14  ;;  %p2399_p9 = scmp.lt.u32.totalorder %s2998_s9, %s3053_s5 }
 0x4b1   : > { %p2400_p10 = scmp.lt.u32.totalorder %s2398_s17, %s2394_s14  ;;  %p2402_p12 = scmp.lt.u32.totalorder %s2394_s14, %s2998_s9 }
 0x4b2   : > { %p2396_p7 = pnand %p2395_p4, %p2515_p5 }
 0x4b3   : > { %p2401_p11 = por %p2400_p10, %p2399_p9 }
 0x4b4   : > { %p2397_p8 = pneg %p2396_p7 }
 0x4b5   : > { %p2403_p13 = por %p2402_p12, %p2401_p11 }
 0x4b7   : > { %p2404_p0 = pnand %p2403_p13, %p2397_p8 }
 0x4b9   : > { %2407 = shalt.err (!%p2404_p0)
}
 0x4ba   : > { %s2445_s26 = smov 128   ;;  %s2446_s30 = smov 8  }
 0x4bb   : > { %2305 = dma.vmem_to_hbm [thread:$0]  (%p2515_p5), %s3000_s6, 4096, %s2998_s9, %s3007_s22, %s2445_s26, %s2445_s26, %s2446_s30  }
 0x4bc PF: > { %p2311_p1 = scmp.ge.s32.totalorder %s2442_s21, 2  ;;  %s1807_s7 = sand.u32 1, %s2430_s18  }
 0x4bd   : > { %s1808_s8 = scalar_lea.sflag [#allocation3], %s1807_s7 }
 0x4be   : > { %p2308_p2 = pnand %p2311_p1, %p2519_p6 }
 0x4c0   : > { %2425 = dma.done.wait (!%p2308_p2), %s1808_s8, 4096  }
 0x4c1   : > { %2427 = vsyncadd (!%p2308_p2), %s1808_s8, 4294963200  ;;  %p15_p3 = scmp.ge.s32.totalorder %s2502_s24, 6   ;;  %s3056_s18 = smov %s2434_s19 }
 0x4c2   : > { %s3057_s19 = smov %s2438_s20  ;;  %s3058_s20 = smov %s2513_s27 }
 0x4c3   : > { %s3059_s21 = smov %s2502_s24  ;;  %17 = sbr.rel (!%p15_p3) target bundleno = 3 (0x3), region = 78 }
 0x4ca   :  { %1813 = vsyncpa [#allocation3], 1 }
 0x4cb   :  { %1815 = vsyncpa [#allocation3 + $0x1], 1 }

</bundles_post_ra>
